<compile_context>
chip_gen: v5e
topology: v5e:2x2
jax: 0.10.0
libtpu: 0.0.40
codegen_flags: <defaults>
</compile_context>

<pallas_src>
import functools

import numpy as np
import jax
import jax.numpy as jnp
from jax.experimental import pallas as pl
from jax.experimental.pallas import tpu as pltpu


# ----------------------------------------------------------------------------
# Pallas kernels
# ----------------------------------------------------------------------------
def _wstage_kernel(x_ref, m_ref, o_ref):
    # x: (H_in*B, W_in*C_in) bf16, rows (h, b), cols (w_in, c_in)
    # m: (W_in*C_in, n_tile)  bf16 slice of the fused width+channel-mix matrix
    # o: (H_in*B, n_tile)     bf16, cols (ky, w_out, c_out)
    o_ref[...] = jnp.dot(x_ref[...], m_ref[...],
                         preferred_element_type=jnp.float32).astype(o_ref.dtype)


def _hstage_in_lrelu_kernel(t_ref, sh_ref, grp_ref, grp_t_ref, gamma_ref,
                            beta_ref, o_ref, *, slope, eps, inv_hw):
    # t : (3*H_in, B*W_out*C_out) bf16, rows (ky, h_in), cols (b, w_out, c)
    # sh: (H_out, 3*H_in) bf16 fused bilinear/shift height operator
    y = jnp.dot(sh_ref[...], t_ref[...], preferred_element_type=jnp.float32)

    # InstanceNorm2d(affine=True): stats per (b, c) over all H_out*W_out
    # positions.  Column groups are gathered / re-broadcast with tiny 0/1
    # matmuls so everything stays 2-D (no in-kernel reshapes/relayouts).
    grp = grp_ref[...]          # (B*W_out*C, B*C)
    grp_t = grp_t_ref[...]      # (B*C, B*W_out*C)
    colsum = jnp.sum(y, axis=0, keepdims=True)                       # (1, BWC)
    mean = jnp.dot(colsum, grp, preferred_element_type=jnp.float32) * inv_hw
    mean_b = jnp.dot(mean, grp_t, preferred_element_type=jnp.float32)
    d = y - mean_b
    var = jnp.dot(jnp.sum(d * d, axis=0, keepdims=True), grp,
                  preferred_element_type=jnp.float32) * inv_hw       # biased
    var_b = jnp.dot(var, grp_t, preferred_element_type=jnp.float32)
    yn = d * jax.lax.rsqrt(var_b + eps) * gamma_ref[...] + beta_ref[...]
    o_ref[...] = jnp.where(yn >= 0.0, yn, slope * yn)                # LeakyReLU


def _hstage_tanh_kernel(t_ref, sh_ref, o_ref):
    y = jnp.dot(sh_ref[...], t_ref[...], preferred_element_type=jnp.float32)
    o_ref[...] = jnp.tanh(y)


# ----------------------------------------------------------------------------
# pallas_call wrappers
# ----------------------------------------------------------------------------
@functools.lru_cache(maxsize=1)
def _vmem_limit():
    # Generation-aware VMEM limit (perf review): ~3/4 of per-core capacity,
    # i.e. ~96 MiB on v5e/v6e (128 MiB) and ~48 MiB on v7x (64 MiB).
    try:
        cap = int(getattr(pltpu.get_tpu_info(), "vmem_capacity_bytes", 0))
        if cap <= 0:
            cap = 64 * 2 ** 20
    except Exception:
        cap = 64 * 2 ** 20          # conservative fallback (v7x-sized)
    return (3 * cap) // 4


def _pick_col_tile(n, max_tile=512):
    """Largest multiple-of-128 divisor of n that is <= max_tile, else n."""
    cands = [t for t in range(128, min(n, max_tile) + 1, 128) if n % t == 0]
    return cands[-1] if cands else n


def _wstage_call(x, m_cat):
    mb, k = x.shape
    n_total = m_cat.shape[1]
    n_tile = _pick_col_tile(n_total)
    return pl.pallas_call(
        _wstage_kernel,
        out_shape=jax.ShapeDtypeStruct((mb, n_total), jnp.bfloat16),
        grid=(n_total // n_tile,),
        in_specs=[
            pl.BlockSpec((mb, k), lambda i: (0, 0)),          # resident LHS
            pl.BlockSpec((k, n_tile), lambda i: (0, i)),      # streamed matrix
        ],
        out_specs=pl.BlockSpec((mb, n_tile), lambda i: (0, i)),
        compiler_params=pltpu.CompilerParams(
            dimension_semantics=("parallel",),                # both TCs on v7x
            vmem_limit_bytes=_vmem_limit()),
    )(x, m_cat)


def _hstage_in_lrelu_call(t2, sh_cat, grp, grp_t, gamma, beta, *, slope,
                          inv_hw):
    h_out = sh_cat.shape[0]
    n = t2.shape[1]
    kernel = functools.partial(_hstage_in_lrelu_kernel, slope=slope, eps=1e-5,
                               inv_hw=inv_hw)
    return pl.pallas_call(
        kernel,
        out_shape=jax.ShapeDtypeStruct((h_out, n), jnp.float32),
        grid=(1,),
        in_specs=[
            pl.BlockSpec(t2.shape, lambda i: (0, 0)),
            pl.BlockSpec(sh_cat.shape, lambda i: (0, 0)),
            pl.BlockSpec(grp.shape, lambda i: (0, 0)),
            pl.BlockSpec(grp_t.shape, lambda i: (0, 0)),
            pl.BlockSpec(gamma.shape, lambda i: (0, 0)),
            pl.BlockSpec(beta.shape, lambda i: (0, 0)),
        ],
        out_specs=pl.BlockSpec((h_out, n), lambda i: (0, 0)),
        compiler_params=pltpu.CompilerParams(
            dimension_semantics=("arbitrary",),
            vmem_limit_bytes=_vmem_limit()),
    )(t2, sh_cat, grp, grp_t, gamma, beta)


def _hstage_tanh_call(t2, sh_cat):
    h_out, k = sh_cat.shape
    n = t2.shape[1]
    tile_m = min(256, h_out)          # H_out is a power of two >= 8
    return pl.pallas_call(
        _hstage_tanh_kernel,
        out_shape=jax.ShapeDtypeStruct((h_out, n), jnp.float32),
        grid=(h_out // tile_m,),
        in_specs=[
            pl.BlockSpec((k, n), lambda i: (0, 0)),           # resident RHS
            pl.BlockSpec((tile_m, k), lambda i: (i, 0)),
        ],
        out_specs=pl.BlockSpec((tile_m, n), lambda i: (i, 0)),
        compiler_params=pltpu.CompilerParams(
            dimension_semantics=("parallel",),
            vmem_limit_bytes=_vmem_limit()),
    )(t2, sh_cat)


def upconv_block(x, m_cat, sh_cat, *, batch, final, grp=None, grp_t=None,
                 gamma=None, beta=None, slope=0.0):
    """One Upsample(x2, bilinear) + Conv2d(3x3, pad=1) [+ IN + LeakyReLU | tanh].

    x: (H_in*B, W_in*C_in) activations, rows (h, b), cols (w, c_in).
    Returns (H_out, B*W_out*C_out), cols (b, w_out, c_out).
    """
    h_out, k3h = sh_cat.shape
    h_in = k3h // 3
    w_in = h_in
    w_out = 2 * w_in
    c_out = m_cat.shape[1] // (3 * w_out)

    # ---- width stage (Pallas): channel mix + bilinear/shift along W ----
    t_cat = _wstage_call(x.astype(jnp.bfloat16), m_cat)

    # ---- inter-stage transpose: wrapper-side layout plumbing (XLA) ----
    # (H_in*B, 3*W_out*C_out) rows (h,b) cols (ky,w,c)
    #   -> (3*H_in, B*W_out*C_out) rows (ky,h) cols (b,w,c)
    t2 = (t_cat.reshape(h_in, batch, 3, w_out * c_out)
                .transpose(2, 0, 1, 3)
                .reshape(3 * h_in, batch * w_out * c_out))

    # ---- height stage + fused epilogue (Pallas) ----
    if final:
        return _hstage_tanh_call(t2, sh_cat)
    return _hstage_in_lrelu_call(t2, sh_cat, grp, grp_t, gamma, beta,
                                 slope=slope, inv_hw=1.0 / (h_out * w_out))


# ----------------------------------------------------------------------------
# Host-side precompute (done ONCE, outside the jitted forward)
# ----------------------------------------------------------------------------
def _bilinear_up_matrix(n):
    """(2n, n) matrix for scale-2 bilinear upsample, align_corners=False."""
    u = np.zeros((2 * n, n), dtype=np.float32)
    for o in range(2 * n):
        src = max((o + 0.5) * 0.5 - 0.5, 0.0)   # PyTorch clamps negative coords
        i0 = min(int(np.floor(src)), n - 1)
        i1 = min(i0 + 1, n - 1)
        frac = src - i0
        u[o, i0] += 1.0 - frac
        u[o, i1] += frac
    return u


def _shift_up_matrix(n, d):
    """(2n, n): bilinear-x2 upsample followed by shift-by-d with zero pad."""
    u = _bilinear_up_matrix(n)
    s = np.zeros((2 * n, n), np.float32)
    for o in range(2 * n):
        if 0 <= o + d < 2 * n:
            s[o] = u[o + d]
    return s


def build_wstage_matrix(w_in, conv_w):
    """Fused width-upsample/shift + channel-mix matrix.

    conv_w: (C_out, C_in, 3, 3).  Result (W_in*C_in, 3*W_out*C_out) with
    rows (w_in, c_in) and cols (ky, w_out, c_out); no batch block-diag.
    """
    conv_w = np.asarray(conv_w, np.float32)
    c_out, c_in = conv_w.shape[0], conv_w.shape[1]
    w_out = 2 * w_in
    sw = np.stack([_shift_up_matrix(w_in, dx) for dx in (-1, 0, 1)], axis=0)
    m = np.einsum("xow,dcyx->wcyod", sw, conv_w)     # (w_in,c_in,ky,w_out,c_out)
    return m.reshape(w_in * c_in, 3 * w_out * c_out)


def build_hstage_matrix(h_in):
    """(H_out, 3*H_in) height operator, cols ordered (ky, h_in)."""
    sh = np.stack([_shift_up_matrix(h_in, dy) for dy in (-1, 0, 1)], axis=0)
    return np.transpose(sh, (1, 0, 2)).reshape(2 * h_in, 3 * h_in)


def build_group_matrix(batch, w_out, c_out):
    """0/1 matrix mapping columns (b, w, c) -> instance-norm group (b, c)."""
    g = np.zeros((batch * w_out * c_out, batch * c_out), np.float32)
    for b in range(batch):
        for w in range(w_out):
            for c in range(c_out):
                g[(b * w_out + w) * c_out + c, b * c_out + c] = 1.0
    return g


def init_params(key, *, nz, ngf, nc, n_classes, image_size):
    mult = image_size // 8
    feat = ngf * mult * 4 * 4
    n_blocks = int(np.log2(mult))
    keys = jax.random.split(key, n_blocks + 2)
    params = {
        "fc_w": jax.random.normal(keys[0], (nz + n_classes, feat), jnp.float32) * 0.05,
        "ln_g": jnp.ones((1, feat), jnp.float32),
        "ln_b": jnp.zeros((1, feat), jnp.float32),
        "convs": [],
    }
    m, i = mult, 1
    while m > 1:
        cin, cout = ngf * m, ngf * (m // 2)
        wc = jax.random.normal(keys[i], (cout, cin, 3, 3), jnp.float32) * 0.05
        params["convs"].append((wc, jnp.ones((cout,), jnp.float32),
                                jnp.zeros((cout,), jnp.float32)))
        m //= 2
        i += 1
    params["final_w"] = jax.random.normal(keys[i], (nc, ngf, 3, 3),
                                          jnp.float32) * 0.05
    return params


def build_plan(params, batch):
    """Precompute bf16 separable operator matrices, IN grouping matrices and
    lane-tiled affine params (plan contains ONLY arrays -> jit-friendly)."""
    plan = {
        "fc_w": params["fc_w"].astype(jnp.float32),
        "ln_g": params["ln_g"].astype(jnp.float32),
        "ln_b": params["ln_b"].astype(jnp.float32),
        "blocks": [],
    }
    size = 4
    for (wc, g, b) in params["convs"]:
        wc_np = np.asarray(wc, np.float32)
        c_out = wc_np.shape[0]
        w_out = 2 * size
        grp = build_group_matrix(batch, w_out, c_out)
        plan["blocks"].append({
            "m_cat": jnp.asarray(build_wstage_matrix(size, wc_np), jnp.bfloat16),
            "sh_cat": jnp.asarray(build_hstage_matrix(size), jnp.bfloat16),
            "grp": jnp.asarray(grp, jnp.float32),
            "grp_t": jnp.asarray(grp.T, jnp.float32),
            "gamma": jnp.asarray(np.tile(np.asarray(g, np.float32),
                                         batch * w_out)[None, :]),
            "beta": jnp.asarray(np.tile(np.asarray(b, np.float32),
                                        batch * w_out)[None, :]),
        })
        size *= 2
    plan["final"] = {
        "m_cat": jnp.asarray(
            build_wstage_matrix(size, np.asarray(params["final_w"], np.float32)),
            jnp.bfloat16),
        "sh_cat": jnp.asarray(build_hstage_matrix(size), jnp.bfloat16),
    }
    return plan


# ----------------------------------------------------------------------------
# Forward
# ----------------------------------------------------------------------------
def upsample_generator_forward(z, class_labels, plan, *, ngf, nc, n_classes,
                               image_size, slope):
    assert image_size % 16 == 0
    B = z.shape[0]
    mult = image_size // 8
    c0 = ngf * mult

    # one-hot "scatter" + concat (glue)
    one_hot = jax.nn.one_hot(class_labels, n_classes, dtype=jnp.float32)
    x = jnp.concatenate([z.astype(jnp.float32), one_hot], axis=1)

    # fc -> LayerNorm -> LeakyReLU (Dropout = inference identity).
    # Plain XLA per perf review: (B, nz+ncls) @ (nz+ncls, feat) is too tiny
    # for a dedicated pallas_call to pay for itself.
    y = jnp.dot(x, plan["fc_w"])
    mean = jnp.mean(y, axis=-1, keepdims=True)
    var = jnp.mean((y - mean) ** 2, axis=-1, keepdims=True)
    y = (y - mean) * jax.lax.rsqrt(var + 1e-5) * plan["ln_g"] + plan["ln_b"]
    y = jnp.where(y >= 0.0, y, slope * y)

    # (B, F) -> NCHW (B, C0, 4, 4) -> kernel layout rows (h, b), cols (w, c)
    h = y.reshape(B, c0, 4, 4).transpose(2, 0, 3, 1).reshape(4 * B, 4 * c0)

    for blk in plan["blocks"]:
        out = upconv_block(h, blk["m_cat"], blk["sh_cat"], batch=B, final=False,
                           grp=blk["grp"], grp_t=blk["grp_t"],
                           gamma=blk["gamma"], beta=blk["beta"], slope=slope)
        # (H_out, B*W_out*C_out) cols (b, w, c) -> next block's (H*B, W*C)
        h = out.reshape(out.shape[0] * B, out.shape[1] // B)

    out = upconv_block(h, plan["final"]["m_cat"], plan["final"]["sh_cat"],
                       batch=B, final=True)

    # (H, B*W*nc) cols (b, w, c) -> NCHW (B, nc, H, W)
    return out.reshape(image_size, B, image_size, nc).transpose(1, 3, 0, 2)


# ----------------------------------------------------------------------------
if __name__ == "__main__":
    nz, ngf, nc, n_classes, image_size = 8, 8, 3, 4, 32
    slope = 0.2          # LeakyReLU negative slope
    B = 2

    key = jax.random.PRNGKey(0)
    k_z, k_lbl, k_params = jax.random.split(key, 3)
    z = jax.random.normal(k_z, (B, nz), jnp.float32)
    labels = jax.random.randint(k_lbl, (B,), 0, n_classes)

    params = init_params(k_params, nz=nz, ngf=ngf, nc=nc,
                         n_classes=n_classes, image_size=image_size)
    plan = build_plan(params, B)     # precomputed once, passed as jit argument

    fwd = jax.jit(functools.partial(
        upsample_generator_forward, ngf=ngf, nc=nc, n_classes=n_classes,
        image_size=image_size, slope=slope))
    out = jax.block_until_ready(fwd(z, labels, plan))

    assert out.shape == (B, nc, image_size, image_size), out.shape
    assert bool(jnp.all(jnp.isfinite(out)))
    assert bool(jnp.all(jnp.abs(out) <= 1.0))    # tanh output range
    print("KERNEL_OK")
</pallas_src>

<mosaic_0001>
module attributes {stable_mosaic.version = 11 : i64} {
  func.func @_wstage_kernel(%arg0: i32, %arg1: memref<8x128xbf16, #tpu.memory_space<vmem>>, %arg2: memref<128x384xbf16, #tpu.memory_space<vmem>>, %arg3: memref<8x384xbf16, #tpu.memory_space<vmem>>) attributes {dimension_semantics = [#tpu.dimension_semantics<parallel>], iteration_bounds = array<i64: 1>, scalar_prefetch = 0 : i64, scratch_operands = 0 : i64, tpu.core_type = #tpu.core_type<tc>, window_params = [{pipeline_mode = #tpu.pipeline_mode<synchronous>, transform_indices = @transform_0, window_bounds = array<i64: 8, 128>}, {transform_indices = @transform_1, window_bounds = array<i64: 128, 384>}, {transform_indices = @transform_2, window_bounds = array<i64: 8, 384>}]} {
    %c0 = arith.constant 0 : index
    %c0_0 = arith.constant 0 : index
    %0 = vector.load %arg1[%c0, %c0_0] : memref<8x128xbf16, #tpu.memory_space<vmem>>, vector<8x128xbf16>
    %c0_1 = arith.constant 0 : index
    %c0_2 = arith.constant 0 : index
    %1 = vector.load %arg2[%c0_1, %c0_2] : memref<128x384xbf16, #tpu.memory_space<vmem>>, vector<128x384xbf16>
    %cst = arith.constant dense<0.000000e+00> : vector<8x384xf32>
    %2 = tpu.matmul %0, %1, %cst {dimension_numbers = #tpu.dot_dimension_numbers<[1], [0], [0], [1], [0, 0, 1, 1], [], []>} : vector<8x128xbf16>, vector<128x384xbf16>, vector<8x384xf32> -> vector<8x384xf32>
    %3 = arith.truncf %2 : vector<8x384xf32> to vector<8x384xbf16>
    %c0_3 = arith.constant 0 : index
    %c0_4 = arith.constant 0 : index
    %4 = vector.load %arg3[%c0_3, %c0_4] : memref<8x384xbf16, #tpu.memory_space<vmem>>, vector<8x384xbf16>
    tpu.vector_store %arg3[%c0_3, %c0_4], %3 {strides = array<i32>} : memref<8x384xbf16, #tpu.memory_space<vmem>>, vector<8x384xbf16>,
    return
  }
  func.func @transform_0(%arg0: i32) -> (i32, i32) {
    %c0_i32 = arith.constant 0 : i32
    %c0_i32_0 = arith.constant 0 : i32
    %c0_i32_1 = arith.constant 0 : i32
    return %c0_i32, %c0_i32_0 : i32, i32
  }
  func.func @transform_1(%arg0: i32) -> (i32, i32) {
    %c0_i32 = arith.constant 0 : i32
    %c0_i32_0 = arith.constant 0 : i32
    return %c0_i32, %arg0 : i32, i32
  }
  func.func @transform_2(%arg0: i32) -> (i32, i32) {
    %c0_i32 = arith.constant 0 : i32
    %c0_i32_0 = arith.constant 0 : i32
    return %c0_i32, %arg0 : i32, i32
  }
}

module attributes {stable_mosaic.version = 11 : i64} {
  func.func @_wstage_kernel(%arg0: i32, %arg1: memref<16x128xbf16, #tpu.memory_space<vmem>>, %arg2: memref<128x384xbf16, #tpu.memory_space<vmem>>, %arg3: memref<16x384xbf16, #tpu.memory_space<vmem>>) attributes {dimension_semantics = [#tpu.dimension_semantics<parallel>], iteration_bounds = array<i64: 1>, scalar_prefetch = 0 : i64, scratch_operands = 0 : i64, tpu.core_type = #tpu.core_type<tc>, window_params = [{pipeline_mode = #tpu.pipeline_mode<synchronous>, transform_indices = @transform_0, window_bounds = array<i64: 16, 128>}, {transform_indices = @transform_1, window_bounds = array<i64: 128, 384>}, {transform_indices = @transform_2, window_bounds = array<i64: 16, 384>}]} {
    %c0 = arith.constant 0 : index
    %c0_0 = arith.constant 0 : index
    %0 = vector.load %arg1[%c0, %c0_0] : memref<16x128xbf16, #tpu.memory_space<vmem>>, vector<16x128xbf16>
    %c0_1 = arith.constant 0 : index
    %c0_2 = arith.constant 0 : index
    %1 = vector.load %arg2[%c0_1, %c0_2] : memref<128x384xbf16, #tpu.memory_space<vmem>>, vector<128x384xbf16>
    %cst = arith.constant dense<0.000000e+00> : vector<16x384xf32>
    %2 = tpu.matmul %0, %1, %cst {dimension_numbers = #tpu.dot_dimension_numbers<[1], [0], [0], [1], [0, 0, 1, 1], [], []>} : vector<16x128xbf16>, vector<128x384xbf16>, vector<16x384xf32> -> vector<16x384xf32>
    %3 = arith.truncf %2 : vector<16x384xf32> to vector<16x384xbf16>
    %c0_3 = arith.constant 0 : index
    %c0_4 = arith.constant 0 : index
    %4 = vector.load %arg3[%c0_3, %c0_4] : memref<16x384xbf16, #tpu.memory_space<vmem>>, vector<16x384xbf16>
    tpu.vector_store %arg3[%c0_3, %c0_4], %3 {strides = array<i32>} : memref<16x384xbf16, #tpu.memory_space<vmem>>, vector<16x384xbf16>,
    return
  }
  func.func @transform_0(%arg0: i32) -> (i32, i32) {
    %c0_i32 = arith.constant 0 : i32
    %c0_i32_0 = arith.constant 0 : i32
    %c0_i32_1 = arith.constant 0 : i32
    return %c0_i32, %c0_i32_0 : i32, i32
  }
  func.func @transform_1(%arg0: i32) -> (i32, i32) {
    %c0_i32 = arith.constant 0 : i32
    %c0_i32_0 = arith.constant 0 : i32
    return %c0_i32, %arg0 : i32, i32
  }
  func.func @transform_2(%arg0: i32) -> (i32, i32) {
    %c0_i32 = arith.constant 0 : i32
    %c0_i32_0 = arith.constant 0 : i32
    return %c0_i32, %arg0 : i32, i32
  }
}

module attributes {stable_mosaic.version = 11 : i64} {
  func.func @_hstage_in_lrelu_kernel(%arg0: i32, %arg1: memref<12x256xbf16, #tpu.memory_space<vmem>>, %arg2: memref<8x12xbf16, #tpu.memory_space<vmem>>, %arg3: memref<256x32xf32, #tpu.memory_space<vmem>>, %arg4: memref<32x256xf32, #tpu.memory_space<vmem>>, %arg5: memref<1x256xf32, #tpu.memory_space<vmem>>, %arg6: memref<1x256xf32, #tpu.memory_space<vmem>>, %arg7: memref<8x256xf32, #tpu.memory_space<vmem>>) attributes {dimension_semantics = [#tpu.dimension_semantics<arbitrary>], iteration_bounds = array<i64: 1>, scalar_prefetch = 0 : i64, scratch_operands = 0 : i64, tpu.core_type = #tpu.core_type<tc>, window_params = [{pipeline_mode = #tpu.pipeline_mode<synchronous>, transform_indices = @transform_0, window_bounds = array<i64: 12, 256>}, {pipeline_mode = #tpu.pipeline_mode<synchronous>, transform_indices = @transform_1, window_bounds = array<i64: 8, 12>}, {pipeline_mode = #tpu.pipeline_mode<synchronous>, transform_indices = @transform_2, window_bounds = array<i64: 256, 32>}, {pipeline_mode = #tpu.pipeline_mode<synchronous>, transform_indices = @transform_3, window_bounds = array<i64: 32, 256>}, {pipeline_mode = #tpu.pipeline_mode<synchronous>, transform_indices = @transform_4, window_bounds = array<i64: 1, 256>}, {pipeline_mode = #tpu.pipeline_mode<synchronous>, transform_indices = @transform_5, window_bounds = array<i64: 1, 256>}, {pipeline_mode = #tpu.pipeline_mode<synchronous>, transform_indices = @transform_6, window_bounds = array<i64: 8, 256>}]} {
    %c0 = arith.constant 0 : index
    %c0_0 = arith.constant 0 : index
    %0 = vector.load %arg2[%c0, %c0_0] : memref<8x12xbf16, #tpu.memory_space<vmem>>, vector<8x12xbf16>
    %c0_1 = arith.constant 0 : index
    %c0_2 = arith.constant 0 : index
    %1 = vector.load %arg1[%c0_1, %c0_2] : memref<12x256xbf16, #tpu.memory_space<vmem>>, vector<12x256xbf16>
    %cst = arith.constant dense<0.000000e+00> : vector<8x256xf32>
    %2 = tpu.matmul %0, %1, %cst {dimension_numbers = #tpu.dot_dimension_numbers<[1], [0], [0], [1], [0, 0, 1, 1], [], []>} : vector<8x12xbf16>, vector<12x256xbf16>, vector<8x256xf32> -> vector<8x256xf32>
    %c0_3 = arith.constant 0 : index
    %c0_4 = arith.constant 0 : index
    %3 = vector.load %arg3[%c0_3, %c0_4] : memref<256x32xf32, #tpu.memory_space<vmem>>, vector<256x32xf32>
    %c0_5 = arith.constant 0 : index
    %c0_6 = arith.constant 0 : index
    %4 = vector.load %arg4[%c0_5, %c0_6] : memref<32x256xf32, #tpu.memory_space<vmem>>, vector<32x256xf32>
    %cst_7 = arith.constant dense<0.000000e+00> : vector<256xf32>
    %5 = vector.multi_reduction <add>, %2, %cst_7 [0] : vector<8x256xf32> to vector<256xf32>
    %6 = vector.shape_cast %5 : vector<256xf32> to vector<1x256xf32>
    %cst_8 = arith.constant dense<0.000000e+00> : vector<1x32xf32>
    %7 = tpu.matmul %6, %3, %cst_8 {dimension_numbers = #tpu.dot_dimension_numbers<[1], [0], [0], [1], [0, 0, 1, 1], [], []>} : vector<1x256xf32>, vector<256x32xf32>, vector<1x32xf32> -> vector<1x32xf32>
    %cst_9 = arith.constant 1.562500e-02 : f32
    %8 = vector.broadcast %cst_9 : f32 to vector<1x32xf32>
    %9 = arith.mulf %7, %8 : vector<1x32xf32>
    %cst_10 = arith.constant dense<0.000000e+00> : vector<1x256xf32>
    %10 = tpu.matmul %9, %4, %cst_10 {dimension_numbers = #tpu.dot_dimension_numbers<[1], [0], [0], [1], [0, 0, 1, 1], [], []>} : vector<1x32xf32>, vector<32x256xf32>, vector<1x256xf32> -> vector<1x256xf32>
    %11 = vector.broadcast %10 : vector<1x256xf32> to vector<8x256xf32>
    %12 = arith.subf %2, %11 : vector<8x256xf32>
    %13 = arith.mulf %12, %12 : vector<8x256xf32>
    %cst_11 = arith.constant dense<0.000000e+00> : vector<256xf32>
    %14 = vector.multi_reduction <add>, %13, %cst_11 [0] : vector<8x256xf32> to vector<256xf32>
    %15 = vector.shape_cast %14 : vector<256xf32> to vector<1x256xf32>
    %cst_12 = arith.constant dense<0.000000e+00> : vector<1x32xf32>
    %16 = tpu.matmul %15, %3, %cst_12 {dimension_numbers = #tpu.dot_dimension_numbers<[1], [0], [0], [1], [0, 0, 1, 1], [], []>} : vector<1x256xf32>, vector<256x32xf32>, vector<1x32xf32> -> vector<1x32xf32>
    %cst_13 = arith.constant 1.562500e-02 : f32
    %17 = vector.broadcast %cst_13 : f32 to vector<1x32xf32>
    %18 = arith.mulf %16, %17 : vector<1x32xf32>
    %cst_14 = arith.constant dense<0.000000e+00> : vector<1x256xf32>
    %19 = tpu.matmul %18, %4, %cst_14 {dimension_numbers = #tpu.dot_dimension_numbers<[1], [0], [0], [1], [0, 0, 1, 1], [], []>} : vector<1x32xf32>, vector<32x256xf32>, vector<1x256xf32> -> vector<1x256xf32>
    %cst_15 = arith.constant 9.99999974E-6 : f32
    %20 = vector.broadcast %cst_15 : f32 to vector<1x256xf32>
    %21 = arith.addf %19, %20 : vector<1x256xf32>
    %22 = math.rsqrt %21 : vector<1x256xf32>
    %23 = vector.broadcast %22 : vector<1x256xf32> to vector<8x256xf32>
    %24 = arith.mulf %12, %23 : vector<8x256xf32>
    %c0_16 = arith.constant 0 : index
    %c0_17 = arith.constant 0 : index
    %25 = vector.load %arg5[%c0_16, %c0_17] : memref<1x256xf32, #tpu.memory_space<vmem>>, vector<1x256xf32>
    %26 = vector.broadcast %25 : vector<1x256xf32> to vector<8x256xf32>
    %27 = arith.mulf %24, %26 : vector<8x256xf32>
    %c0_18 = arith.constant 0 : index
    %c0_19 = arith.constant 0 : index
    %28 = vector.load %arg6[%c0_18, %c0_19] : memref<1x256xf32, #tpu.memory_space<vmem>>, vector<1x256xf32>
    %29 = vector.broadcast %28 : vector<1x256xf32> to vector<8x256xf32>
    %30 = arith.addf %27, %29 : vector<8x256xf32>
    %cst_20 = arith.constant 0.000000e+00 : f32
    %31 = vector.broadcast %cst_20 : f32 to vector<8x256xf32>
    %32 = arith.cmpf oge, %30, %31 : vector<8x256xf32>
    %cst_21 = arith.constant 2.000000e-01 : f32
    %33 = vector.broadcast %cst_21 : f32 to vector<8x256xf32>
    %34 = arith.mulf %33, %30 : vector<8x256xf32>
    %35 = arith.select %32, %30, %34 : vector<8x256xi1>, vector<8x256xf32>
    %c0_22 = arith.constant 0 : index
    %c0_23 = arith.constant 0 : index
    %36 = vector.load %arg7[%c0_22, %c0_23] : memref<8x256xf32, #tpu.memory_space<vmem>>, vector<8x256xf32>
    tpu.vector_store %arg7[%c0_22, %c0_23], %35 {strides = array<i32>} : memref<8x256xf32, #tpu.memory_space<vmem>>, vector<8x256xf32>,
    return
  }
  func.func @transform_0(%arg0: i32) -> (i32, i32) {
    %c0_i32 = arith.constant 0 : i32
    %c0_i32_0 = arith.constant 0 : i32
    %c0_i32_1 = arith.constant 0 : i32
    return %c0_i32, %c0_i32_0 : i32, i32
  }
  func.func @transform_1(%arg0: i32) -> (i32, i32) {
    %c0_i32 = arith.constant 0 : i32
    %c0_i32_0 = arith.constant 0 : i32
    %c0_i32_1 = arith.constant 0 : i32
    return %c0_i32, %c0_i32_0 : i32, i32
  }
  func.func @transform_2(%arg0: i32) -> (i32, i32) {
    %c0_i32 = arith.constant 0 : i32
    %c0_i32_0 = arith.constant 0 : i32
    %c0_i32_1 = arith.constant 0 : i32
    return %c0_i32, %c0_i32_0 : i32, i32
  }
  func.func @transform_3(%arg0: i32) -> (i32, i32) {
    %c0_i32 = arith.constant 0 : i32
    %c0_i32_0 = arith.constant 0 : i32
    %c0_i32_1 = arith.constant 0 : i32
    return %c0_i32, %c0_i32_0 : i32, i32
  }
  func.func @transform_4(%arg0: i32) -> (i32, i32) {
    %c0_i32 = arith.constant 0 : i32
    %c0_i32_0 = arith.constant 0 : i32
    %c0_i32_1 = arith.constant 0 : i32
    return %c0_i32, %c0_i32_0 : i32, i32
  }
  func.func @transform_5(%arg0: i32) -> (i32, i32) {
    %c0_i32 = arith.constant 0 : i32
    %c0_i32_0 = arith.constant 0 : i32
    %c0_i32_1 = arith.constant 0 : i32
    return %c0_i32, %c0_i32_0 : i32, i32
  }
  func.func @transform_6(%arg0: i32) -> (i32, i32) {
    %c0_i32 = arith.constant 0 : i32
    %c0_i32_0 = arith.constant 0 : i32
    %c0_i32_1 = arith.constant 0 : i32
    return %c0_i32, %c0_i32_0 : i32, i32
  }
}

module attributes {stable_mosaic.version = 11 : i64} {
  func.func @_hstage_in_lrelu_kernel(%arg0: i32, %arg1: memref<24x256xbf16, #tpu.memory_space<vmem>>, %arg2: memref<16x24xbf16, #tpu.memory_space<vmem>>, %arg3: memref<256x16xf32, #tpu.memory_space<vmem>>, %arg4: memref<16x256xf32, #tpu.memory_space<vmem>>, %arg5: memref<1x256xf32, #tpu.memory_space<vmem>>, %arg6: memref<1x256xf32, #tpu.memory_space<vmem>>, %arg7: memref<16x256xf32, #tpu.memory_space<vmem>>) attributes {dimension_semantics = [#tpu.dimension_semantics<arbitrary>], iteration_bounds = array<i64: 1>, scalar_prefetch = 0 : i64, scratch_operands = 0 : i64, tpu.core_type = #tpu.core_type<tc>, window_params = [{pipeline_mode = #tpu.pipeline_mode<synchronous>, transform_indices = @transform_0, window_bounds = array<i64: 24, 256>}, {pipeline_mode = #tpu.pipeline_mode<synchronous>, transform_indices = @transform_1, window_bounds = array<i64: 16, 24>}, {pipeline_mode = #tpu.pipeline_mode<synchronous>, transform_indices = @transform_2, window_bounds = array<i64: 256, 16>}, {pipeline_mode = #tpu.pipeline_mode<synchronous>, transform_indices = @transform_3, window_bounds = array<i64: 16, 256>}, {pipeline_mode = #tpu.pipeline_mode<synchronous>, transform_indices = @transform_4, window_bounds = array<i64: 1, 256>}, {pipeline_mode = #tpu.pipeline_mode<synchronous>, transform_indices = @transform_5, window_bounds = array<i64: 1, 256>}, {pipeline_mode = #tpu.pipeline_mode<synchronous>, transform_indices = @transform_6, window_bounds = array<i64: 16, 256>}]} {
    %c0 = arith.constant 0 : index
    %c0_0 = arith.constant 0 : index
    %0 = vector.load %arg2[%c0, %c0_0] : memref<16x24xbf16, #tpu.memory_space<vmem>>, vector<16x24xbf16>
    %c0_1 = arith.constant 0 : index
    %c0_2 = arith.constant 0 : index
    %1 = vector.load %arg1[%c0_1, %c0_2] : memref<24x256xbf16, #tpu.memory_space<vmem>>, vector<24x256xbf16>
    %cst = arith.constant dense<0.000000e+00> : vector<16x256xf32>
    %2 = tpu.matmul %0, %1, %cst {dimension_numbers = #tpu.dot_dimension_numbers<[1], [0], [0], [1], [0, 0, 1, 1], [], []>} : vector<16x24xbf16>, vector<24x256xbf16>, vector<16x256xf32> -> vector<16x256xf32>
    %c0_3 = arith.constant 0 : index
    %c0_4 = arith.constant 0 : index
    %3 = vector.load %arg3[%c0_3, %c0_4] : memref<256x16xf32, #tpu.memory_space<vmem>>, vector<256x16xf32>
    %c0_5 = arith.constant 0 : index
    %c0_6 = arith.constant 0 : index
    %4 = vector.load %arg4[%c0_5, %c0_6] : memref<16x256xf32, #tpu.memory_space<vmem>>, vector<16x256xf32>
    %cst_7 = arith.constant dense<0.000000e+00> : vector<256xf32>
    %5 = vector.multi_reduction <add>, %2, %cst_7 [0] : vector<16x256xf32> to vector<256xf32>
    %6 = vector.shape_cast %5 : vector<256xf32> to vector<1x256xf32>
    %cst_8 = arith.constant dense<0.000000e+00> : vector<1x16xf32>
    %7 = tpu.matmul %6, %3, %cst_8 {dimension_numbers = #tpu.dot_dimension_numbers<[1], [0], [0], [1], [0, 0, 1, 1], [], []>} : vector<1x256xf32>, vector<256x16xf32>, vector<1x16xf32> -> vector<1x16xf32>
    %cst_9 = arith.constant 3.906250e-03 : f32
    %8 = vector.broadcast %cst_9 : f32 to vector<1x16xf32>
    %9 = arith.mulf %7, %8 : vector<1x16xf32>
    %cst_10 = arith.constant dense<0.000000e+00> : vector<1x256xf32>
    %10 = tpu.matmul %9, %4, %cst_10 {dimension_numbers = #tpu.dot_dimension_numbers<[1], [0], [0], [1], [0, 0, 1, 1], [], []>} : vector<1x16xf32>, vector<16x256xf32>, vector<1x256xf32> -> vector<1x256xf32>
    %11 = vector.broadcast %10 : vector<1x256xf32> to vector<16x256xf32>
    %12 = arith.subf %2, %11 : vector<16x256xf32>
    %13 = arith.mulf %12, %12 : vector<16x256xf32>
    %cst_11 = arith.constant dense<0.000000e+00> : vector<256xf32>
    %14 = vector.multi_reduction <add>, %13, %cst_11 [0] : vector<16x256xf32> to vector<256xf32>
    %15 = vector.shape_cast %14 : vector<256xf32> to vector<1x256xf32>
    %cst_12 = arith.constant dense<0.000000e+00> : vector<1x16xf32>
    %16 = tpu.matmul %15, %3, %cst_12 {dimension_numbers = #tpu.dot_dimension_numbers<[1], [0], [0], [1], [0, 0, 1, 1], [], []>} : vector<1x256xf32>, vector<256x16xf32>, vector<1x16xf32> -> vector<1x16xf32>
    %cst_13 = arith.constant 3.906250e-03 : f32
    %17 = vector.broadcast %cst_13 : f32 to vector<1x16xf32>
    %18 = arith.mulf %16, %17 : vector<1x16xf32>
    %cst_14 = arith.constant dense<0.000000e+00> : vector<1x256xf32>
    %19 = tpu.matmul %18, %4, %cst_14 {dimension_numbers = #tpu.dot_dimension_numbers<[1], [0], [0], [1], [0, 0, 1, 1], [], []>} : vector<1x16xf32>, vector<16x256xf32>, vector<1x256xf32> -> vector<1x256xf32>
    %cst_15 = arith.constant 9.99999974E-6 : f32
    %20 = vector.broadcast %cst_15 : f32 to vector<1x256xf32>
    %21 = arith.addf %19, %20 : vector<1x256xf32>
    %22 = math.rsqrt %21 : vector<1x256xf32>
    %23 = vector.broadcast %22 : vector<1x256xf32> to vector<16x256xf32>
    %24 = arith.mulf %12, %23 : vector<16x256xf32>
    %c0_16 = arith.constant 0 : index
    %c0_17 = arith.constant 0 : index
    %25 = vector.load %arg5[%c0_16, %c0_17] : memref<1x256xf32, #tpu.memory_space<vmem>>, vector<1x256xf32>
    %26 = vector.broadcast %25 : vector<1x256xf32> to vector<16x256xf32>
    %27 = arith.mulf %24, %26 : vector<16x256xf32>
    %c0_18 = arith.constant 0 : index
    %c0_19 = arith.constant 0 : index
    %28 = vector.load %arg6[%c0_18, %c0_19] : memref<1x256xf32, #tpu.memory_space<vmem>>, vector<1x256xf32>
    %29 = vector.broadcast %28 : vector<1x256xf32> to vector<16x256xf32>
    %30 = arith.addf %27, %29 : vector<16x256xf32>
    %cst_20 = arith.constant 0.000000e+00 : f32
    %31 = vector.broadcast %cst_20 : f32 to vector<16x256xf32>
    %32 = arith.cmpf oge, %30, %31 : vector<16x256xf32>
    %cst_21 = arith.constant 2.000000e-01 : f32
    %33 = vector.broadcast %cst_21 : f32 to vector<16x256xf32>
    %34 = arith.mulf %33, %30 : vector<16x256xf32>
    %35 = arith.select %32, %30, %34 : vector<16x256xi1>, vector<16x256xf32>
    %c0_22 = arith.constant 0 : index
    %c0_23 = arith.constant 0 : index
    %36 = vector.load %arg7[%c0_22, %c0_23] : memref<16x256xf32, #tpu.memory_space<vmem>>, vector<16x256xf32>
    tpu.vector_store %arg7[%c0_22, %c0_23], %35 {strides = array<i32>} : memref<16x256xf32, #tpu.memory_space<vmem>>, vector<16x256xf32>,
    return
  }
  func.func @transform_0(%arg0: i32) -> (i32, i32) {
    %c0_i32 = arith.constant 0 : i32
    %c0_i32_0 = arith.constant 0 : i32
    %c0_i32_1 = arith.constant 0 : i32
    return %c0_i32, %c0_i32_0 : i32, i32
  }
  func.func @transform_1(%arg0: i32) -> (i32, i32) {
    %c0_i32 = arith.constant 0 : i32
    %c0_i32_0 = arith.constant 0 : i32
    %c0_i32_1 = arith.constant 0 : i32
    return %c0_i32, %c0_i32_0 : i32, i32
  }
  func.func @transform_2(%arg0: i32) -> (i32, i32) {
    %c0_i32 = arith.constant 0 : i32
    %c0_i32_0 = arith.constant 0 : i32
    %c0_i32_1 = arith.constant 0 : i32
    return %c0_i32, %c0_i32_0 : i32, i32
  }
  func.func @transform_3(%arg0: i32) -> (i32, i32) {
    %c0_i32 = arith.constant 0 : i32
    %c0_i32_0 = arith.constant 0 : i32
    %c0_i32_1 = arith.constant 0 : i32
    return %c0_i32, %c0_i32_0 : i32, i32
  }
  func.func @transform_4(%arg0: i32) -> (i32, i32) {
    %c0_i32 = arith.constant 0 : i32
    %c0_i32_0 = arith.constant 0 : i32
    %c0_i32_1 = arith.constant 0 : i32
    return %c0_i32, %c0_i32_0 : i32, i32
  }
  func.func @transform_5(%arg0: i32) -> (i32, i32) {
    %c0_i32 = arith.constant 0 : i32
    %c0_i32_0 = arith.constant 0 : i32
    %c0_i32_1 = arith.constant 0 : i32
    return %c0_i32, %c0_i32_0 : i32, i32
  }
  func.func @transform_6(%arg0: i32) -> (i32, i32) {
    %c0_i32 = arith.constant 0 : i32
    %c0_i32_0 = arith.constant 0 : i32
    %c0_i32_1 = arith.constant 0 : i32
    return %c0_i32, %c0_i32_0 : i32, i32
  }
}

module attributes {stable_mosaic.version = 11 : i64} {
  func.func @_wstage_kernel(%arg0: i32, %arg1: memref<32x128xbf16, #tpu.memory_space<vmem>>, %arg2: memref<128x288xbf16, #tpu.memory_space<vmem>>, %arg3: memref<32x288xbf16, #tpu.memory_space<vmem>>) attributes {dimension_semantics = [#tpu.dimension_semantics<parallel>], iteration_bounds = array<i64: 1>, scalar_prefetch = 0 : i64, scratch_operands = 0 : i64, tpu.core_type = #tpu.core_type<tc>, window_params = [{pipeline_mode = #tpu.pipeline_mode<synchronous>, transform_indices = @transform_0, window_bounds = array<i64: 32, 128>}, {transform_indices = @transform_1, window_bounds = array<i64: 128, 288>}, {transform_indices = @transform_2, window_bounds = array<i64: 32, 288>}]} {
    %c0 = arith.constant 0 : index
    %c0_0 = arith.constant 0 : index
    %0 = vector.load %arg1[%c0, %c0_0] : memref<32x128xbf16, #tpu.memory_space<vmem>>, vector<32x128xbf16>
    %c0_1 = arith.constant 0 : index
    %c0_2 = arith.constant 0 : index
    %1 = vector.load %arg2[%c0_1, %c0_2] : memref<128x288xbf16, #tpu.memory_space<vmem>>, vector<128x288xbf16>
    %cst = arith.constant dense<0.000000e+00> : vector<32x288xf32>
    %2 = tpu.matmul %0, %1, %cst {dimension_numbers = #tpu.dot_dimension_numbers<[1], [0], [0], [1], [0, 0, 1, 1], [], []>} : vector<32x128xbf16>, vector<128x288xbf16>, vector<32x288xf32> -> vector<32x288xf32>
    %3 = arith.truncf %2 : vector<32x288xf32> to vector<32x288xbf16>
    %c0_3 = arith.constant 0 : index
    %c0_4 = arith.constant 0 : index
    %4 = vector.load %arg3[%c0_3, %c0_4] : memref<32x288xbf16, #tpu.memory_space<vmem>>, vector<32x288xbf16>
    tpu.vector_store %arg3[%c0_3, %c0_4], %3 {strides = array<i32>} : memref<32x288xbf16, #tpu.memory_space<vmem>>, vector<32x288xbf16>,
    return
  }
  func.func @transform_0(%arg0: i32) -> (i32, i32) {
    %c0_i32 = arith.constant 0 : i32
    %c0_i32_0 = arith.constant 0 : i32
    %c0_i32_1 = arith.constant 0 : i32
    return %c0_i32, %c0_i32_0 : i32, i32
  }
  func.func @transform_1(%arg0: i32) -> (i32, i32) {
    %c0_i32 = arith.constant 0 : i32
    %c0_i32_0 = arith.constant 0 : i32
    return %c0_i32, %arg0 : i32, i32
  }
  func.func @transform_2(%arg0: i32) -> (i32, i32) {
    %c0_i32 = arith.constant 0 : i32
    %c0_i32_0 = arith.constant 0 : i32
    return %c0_i32, %arg0 : i32, i32
  }
}

module attributes {stable_mosaic.version = 11 : i64} {
  func.func @_hstage_tanh_kernel(%arg0: i32, %arg1: memref<48x192xbf16, #tpu.memory_space<vmem>>, %arg2: memref<32x48xbf16, #tpu.memory_space<vmem>>, %arg3: memref<32x192xf32, #tpu.memory_space<vmem>>) attributes {dimension_semantics = [#tpu.dimension_semantics<parallel>], iteration_bounds = array<i64: 1>, scalar_prefetch = 0 : i64, scratch_operands = 0 : i64, tpu.core_type = #tpu.core_type<tc>, window_params = [{pipeline_mode = #tpu.pipeline_mode<synchronous>, transform_indices = @transform_0, window_bounds = array<i64: 48, 192>}, {transform_indices = @transform_1, window_bounds = array<i64: 32, 48>}, {transform_indices = @transform_2, window_bounds = array<i64: 32, 192>}]} {
    %c0 = arith.constant 0 : index
    %c0_0 = arith.constant 0 : index
    %0 = vector.load %arg2[%c0, %c0_0] : memref<32x48xbf16, #tpu.memory_space<vmem>>, vector<32x48xbf16>
    %c0_1 = arith.constant 0 : index
    %c0_2 = arith.constant 0 : index
    %1 = vector.load %arg1[%c0_1, %c0_2] : memref<48x192xbf16, #tpu.memory_space<vmem>>, vector<48x192xbf16>
    %cst = arith.constant dense<0.000000e+00> : vector<32x192xf32>
    %2 = tpu.matmul %0, %1, %cst {dimension_numbers = #tpu.dot_dimension_numbers<[1], [0], [0], [1], [0, 0, 1, 1], [], []>} : vector<32x48xbf16>, vector<48x192xbf16>, vector<32x192xf32> -> vector<32x192xf32>
    %3 = math.tanh %2 : vector<32x192xf32>
    %c0_3 = arith.constant 0 : index
    %c0_4 = arith.constant 0 : index
    %4 = vector.load %arg3[%c0_3, %c0_4] : memref<32x192xf32, #tpu.memory_space<vmem>>, vector<32x192xf32>
    tpu.vector_store %arg3[%c0_3, %c0_4], %3 {strides = array<i32>} : memref<32x192xf32, #tpu.memory_space<vmem>>, vector<32x192xf32>,
    return
  }
  func.func @transform_0(%arg0: i32) -> (i32, i32) {
    %c0_i32 = arith.constant 0 : i32
    %c0_i32_0 = arith.constant 0 : i32
    %c0_i32_1 = arith.constant 0 : i32
    return %c0_i32, %c0_i32_0 : i32, i32
  }
  func.func @transform_1(%arg0: i32) -> (i32, i32) {
    %c0_i32 = arith.constant 0 : i32
    %c0_i32_0 = arith.constant 0 : i32
    return %arg0, %c0_i32 : i32, i32
  }
  func.func @transform_2(%arg0: i32) -> (i32, i32) {
    %c0_i32 = arith.constant 0 : i32
    %c0_i32_0 = arith.constant 0 : i32
    return %arg0, %c0_i32 : i32, i32
  }
}

</mosaic_0001>

<bundles_post_ra>
// kernel: upsample_generator_forward.6
= control target key start
LH: loop header
LB: loop body
LE: loop exit
PB: predicated region body
PF: predicated region fallthrough
CT: control target
= control target key end

     0   :  { %s507_s1 = inlined_call_operand.vmem [shape: bf16[128,384], index: 1, kind: input, shape index: {}]   ;;  %s508_s0 = inlined_call_operand.vmem [shape: bf16[8,128], index: 0, kind: input, shape index: {}]   ;;  %s509_s2 = inlined_call_operand.vmem [shape: bf16[8,384], index: 2, kind: output, shape index: {}]  }
   0x1   :  { %v305_v0 = vld [vmem:[%s507_s1 + $0xa8] sm:$0xf]  ;;  %v337_v1 = vld [vmem:[%s507_s1 + $0xb0] sm:$0xf0]  ;;  %v336_v2 = vld [vmem:[%s507_s1 + $0xac] sm:$0xf] }
   0x2   :  { %v306_v3 = vor.u32 %v337_v1, %v305_v0  ;;  %v307_v4 = vld [vmem:[%s507_s1 + $0xb4] sm:$0xf0]  ;;  %v313_v5 = vld [vmem:[%s507_s1 + $0xb0] sm:$0xf]  ;;  %v338_v6 = vld [vmem:[%s507_s1 + $0xb8] sm:$0xf0] }
   0x3   :  { %v310_v7 = vor.u32 %v336_v2, %v307_v4  ;;  %v314_v8 = vor.u32 %v338_v6, %v313_v5  ;;  %v293_v9 = vld [vmem:[%s507_s1 + $0x90] sm:$0xf]  ;;  %v334_v10 = vld [vmem:[%s507_s1 + $0x98] sm:$0xf0]  ;;  %v333_v11 = vld [vmem:[%s507_s1 + $0x94] sm:$0xf] }
   0x4   :  { %172 = vmatpush.bf16.msra.mxu0 %v306_v3  ;;  %v294_v12 = vor.u32 %v334_v10, %v293_v9  ;;  %v295_v13 = vld [vmem:[%s507_s1 + $0x9c] sm:$0xf0]  ;;  %v301_v14 = vld [vmem:[%s507_s1 + $0x98] sm:$0xf]  ;;  %v335_v15 = vld [vmem:[%s507_s1 + $0xa0] sm:$0xf0] }
   0x5   :  { %185 = vmatpush.bf16.msra.mxu1 %v310_v7  ;;  %198 = vmatpush.bf16.msra.mxu2 %v314_v8  ;;  %v298_v16 = vor.u32 %v333_v11, %v295_v13  ;;  %v302_v17 = vor.u32 %v335_v15, %v301_v14  ;;  %v281_v18 = vld [vmem:[%s507_s1 + $0x78] sm:$0xf]  ;;  %v331_v19 = vld [vmem:[%s507_s1 + $0x80] sm:$0xf0]  ;;  %v330_v20 = vld [vmem:[%s507_s1 + $0x7c] sm:$0xf] }
   0x6   :  { %v283_v21 = vld [vmem:[%s507_s1 + $0x84] sm:$0xf0]  ;;  %v289_v22 = vld [vmem:[%s507_s1 + $0x80] sm:$0xf]  ;;  %v332_v23 = vld [vmem:[%s507_s1 + $0x88] sm:$0xf0]  ;;  %v282_v24 = vor.u32 %v331_v19, %v281_v18 }
   0x7   :  { %v286_v25 = vor.u32 %v330_v20, %v283_v21  ;;  %v290_v26 = vor.u32 %v332_v23, %v289_v22  ;;  %v269_v27 = vld [vmem:[%s507_s1 + $0x60] sm:$0xf]  ;;  %v328_v28 = vld [vmem:[%s507_s1 + $0x68] sm:$0xf0]  ;;  %v327_v29 = vld [vmem:[%s507_s1 + $0x64] sm:$0xf] }
   0x8   :  { %173 = vmatpush.bf16.msra.mxu0 %v294_v12  ;;  %v271_v30 = vld [vmem:[%s507_s1 + $0x6c] sm:$0xf0]  ;;  %v277_v31 = vld [vmem:[%s507_s1 + $0x68] sm:$0xf]  ;;  %v329_v32 = vld [vmem:[%s507_s1 + $0x70] sm:$0xf0]  ;;  %v270_v33 = vor.u32 %v328_v28, %v269_v27 }
   0x9   :  { %186 = vmatpush.bf16.msra.mxu1 %v298_v16  ;;  %199 = vmatpush.bf16.msra.mxu2 %v302_v17  ;;  %v274_v34 = vor.u32 %v327_v29, %v271_v30  ;;  %v278_v35 = vor.u32 %v329_v32, %v277_v31  ;;  %v257_v36 = vld [vmem:[%s507_s1 + $0x48] sm:$0xf]  ;;  %v325_v37 = vld [vmem:[%s507_s1 + $0x50] sm:$0xf0]  ;;  %v324_v38 = vld [vmem:[%s507_s1 + $0x4c] sm:$0xf] }
   0xa   :  { %v259_v39 = vld [vmem:[%s507_s1 + $0x54] sm:$0xf0]  ;;  %v265_v40 = vld [vmem:[%s507_s1 + $0x50] sm:$0xf]  ;;  %v326_v41 = vld [vmem:[%s507_s1 + $0x58] sm:$0xf0]  ;;  %v258_v42 = vor.u32 %v325_v37, %v257_v36 }
   0xb   :  { %v262_v43 = vor.u32 %v324_v38, %v259_v39  ;;  %v266_v44 = vor.u32 %v326_v41, %v265_v40  ;;  %v245_v45 = vld [vmem:[%s507_s1 + $0x30] sm:$0xf]  ;;  %v322_v46 = vld [vmem:[%s507_s1 + $0x38] sm:$0xf0]  ;;  %v321_v47 = vld [vmem:[%s507_s1 + $0x34] sm:$0xf] }
   0xc   :  { %174 = vmatpush.bf16.msra.mxu0 %v282_v24  ;;  %v247_v48 = vld [vmem:[%s507_s1 + $0x3c] sm:$0xf0]  ;;  %v253_v49 = vld [vmem:[%s507_s1 + $0x38] sm:$0xf]  ;;  %v323_v50 = vld [vmem:[%s507_s1 + $0x40] sm:$0xf0]  ;;  %v246_v51 = vor.u32 %v322_v46, %v245_v45 }
   0xd   :  { %187 = vmatpush.bf16.msra.mxu1 %v286_v25  ;;  %200 = vmatpush.bf16.msra.mxu2 %v290_v26  ;;  %v250_v52 = vor.u32 %v321_v47, %v247_v48  ;;  %v254_v53 = vor.u32 %v323_v50, %v253_v49  ;;  %v233_v54 = vld [vmem:[%s507_s1 + $0x18] sm:$0xf]  ;;  %v319_v55 = vld [vmem:[%s507_s1 + $0x20] sm:$0xf0]  ;;  %v318_v56 = vld [vmem:[%s507_s1 + $0x1c] sm:$0xf] }
   0xe   :  { %v235_v57 = vld [vmem:[%s507_s1 + $0x24] sm:$0xf0]  ;;  %v241_v58 = vld [vmem:[%s507_s1 + $0x20] sm:$0xf]  ;;  %v320_v59 = vld [vmem:[%s507_s1 + $0x28] sm:$0xf0]  ;;  %v234_v60 = vor.u32 %v319_v55, %v233_v54 }
   0xf   :  { %v238_v61 = vor.u32 %v318_v56, %v235_v57  ;;  %v242_v62 = vor.u32 %v320_v59, %v241_v58  ;;  %v221_v63 = vld [vmem:[%s507_s1] sm:$0xf]  ;;  %v316_v0 = vld [vmem:[%s507_s1 + $0x8] sm:$0xf0]  ;;  %v315_v1 = vld [vmem:[%s507_s1 + $0x4] sm:$0xf] }
  0x10   :  { %175 = vmatpush.bf16.msra.mxu0 %v270_v33  ;;  %v223_v2 = vld [vmem:[%s507_s1 + $0xc] sm:$0xf0]  ;;  %v229_v3 = vld [vmem:[%s507_s1 + $0x8] sm:$0xf]  ;;  %v317_v4 = vld [vmem:[%s507_s1 + $0x10] sm:$0xf0]  ;;  %v222_v5 = vor.u32 %v316_v0, %v221_v63 }
  0x11   :  { %188 = vmatpush.bf16.msra.mxu1 %v274_v34  ;;  %201 = vmatpush.bf16.msra.mxu2 %v278_v35  ;;  %v226_v6 = vor.u32 %v315_v1, %v223_v2  ;;  %v230_v7 = vor.u32 %v317_v4, %v229_v3  ;;  %v11_v8 = vld [vmem:[%s508_s0] sm:$0xf] }
  0x14   :  { %176 = vmatpush.bf16.msra.mxu0 %v258_v42 }
  0x15   :  { %189 = vmatpush.bf16.msra.mxu1 %v262_v43  ;;  %202 = vmatpush.bf16.msra.mxu2 %v266_v44 }
  0x18   :  { %177 = vmatpush.bf16.msra.mxu0 %v246_v51 }
  0x19   :  { %190 = vmatpush.bf16.msra.mxu1 %v250_v52  ;;  %203 = vmatpush.bf16.msra.mxu2 %v254_v53 }
  0x1c   :  { %178 = vmatpush.bf16.msra.mxu0 %v234_v60 }
  0x1d   :  { %191 = vmatpush.bf16.msra.mxu1 %v238_v61  ;;  %204 = vmatpush.bf16.msra.mxu2 %v242_v62 }
  0x20   :  { %179 = vmatpush.bf16.msra.mxu0 %v222_v5 }
  0x21   :  { %192 = vmatpush.bf16.msra.mxu1 %v226_v6  ;;  %205 = vmatpush.bf16.msra.mxu2 %v230_v7 }
  0x23   :  { %180 = vmatmul.bf16.vlgmr.msra.gmra.mxu0 %v11_v8 }
  0x24   :  { %193 = vmatmul.bf16.vlgmr.msra.gmra.mxu1 %v11_v8  ;;  %206 = vmatmul.bf16.vlgmr.msra.gmra.mxu2 %v11_v8 }
  0xa0   :  { %v181_v9 = vpop.f32.mrf.mxu0 }
  0xa1   :  { %v194_v10 = vpop.f32.mrf.mxu1 }
  0xa2   :  { %v211_v11 = vpack.c.bf16 %v194_v10, %v181_v9 }
  0xa4   :  { %213 = vst [vmem:[%s509_s2] sm:$0xff] %v211_v11 }
  0xa7   :  { %v207_v12 = vpop.f32.mrf.mxu2 }
  0xa8   :  { %v212_v13 = vpack.c.bf16 %v207_v12, %v207_v12  ;;  %v183_v14 = vpop.f32.mrf.mxu0 }
  0xa9   :  { %v196_v15 = vpop.f32.mrf.mxu1 }
  0xaa   :  { %214 = vst [vmem:[%s509_s2 + $0x8] sm:$0xf] %v212_v13 }
  0xaf   :  { %v209_v16 = vpop.f32.mrf.mxu2 }

// kernel: upsample_generator_forward.8
= control target key start
LH: loop header
LB: loop body
LE: loop exit
PB: predicated region body
PF: predicated region fallthrough
CT: control target
= control target key end

     0   :  { %s532_s1 = inlined_call_operand.vmem [shape: bf16[128,384], index: 1, kind: input, shape index: {}]   ;;  %s533_s0 = inlined_call_operand.vmem [shape: bf16[16,128], index: 0, kind: input, shape index: {}]   ;;  %s534_s2 = inlined_call_operand.vmem [shape: bf16[16,384], index: 2, kind: output, shape index: {}]  }
   0x1   :  { %v323_v0 = vld [vmem:[%s532_s1 + $0xa8] sm:$0xf]  ;;  %v356_v1 = vld [vmem:[%s532_s1 + $0xb0] sm:$0xf0]  ;;  %v355_v2 = vld [vmem:[%s532_s1 + $0xac] sm:$0xf] }
   0x2   :  { %v324_v3 = vor.u32 %v356_v1, %v323_v0  ;;  %v325_v4 = vld [vmem:[%s532_s1 + $0xb4] sm:$0xf0]  ;;  %v331_v5 = vld [vmem:[%s532_s1 + $0xb0] sm:$0xf]  ;;  %v357_v6 = vld [vmem:[%s532_s1 + $0xb8] sm:$0xf0] }
   0x3   :  { %v328_v7 = vor.u32 %v355_v2, %v325_v4  ;;  %v332_v8 = vor.u32 %v357_v6, %v331_v5  ;;  %v311_v9 = vld [vmem:[%s532_s1 + $0x90] sm:$0xf]  ;;  %v353_v10 = vld [vmem:[%s532_s1 + $0x98] sm:$0xf0]  ;;  %v352_v11 = vld [vmem:[%s532_s1 + $0x94] sm:$0xf] }
   0x4   :  { %179 = vmatpush.bf16.msra.mxu0 %v324_v3  ;;  %v312_v12 = vor.u32 %v353_v10, %v311_v9  ;;  %v313_v13 = vld [vmem:[%s532_s1 + $0x9c] sm:$0xf0]  ;;  %v319_v14 = vld [vmem:[%s532_s1 + $0x98] sm:$0xf]  ;;  %v354_v15 = vld [vmem:[%s532_s1 + $0xa0] sm:$0xf0] }
   0x5   :  { %193 = vmatpush.bf16.msra.mxu1 %v328_v7  ;;  %207 = vmatpush.bf16.msra.mxu2 %v332_v8  ;;  %v316_v16 = vor.u32 %v352_v11, %v313_v13  ;;  %v320_v17 = vor.u32 %v354_v15, %v319_v14  ;;  %v299_v18 = vld [vmem:[%s532_s1 + $0x78] sm:$0xf]  ;;  %v350_v19 = vld [vmem:[%s532_s1 + $0x80] sm:$0xf0]  ;;  %v349_v20 = vld [vmem:[%s532_s1 + $0x7c] sm:$0xf] }
   0x6   :  { %v301_v21 = vld [vmem:[%s532_s1 + $0x84] sm:$0xf0]  ;;  %v307_v22 = vld [vmem:[%s532_s1 + $0x80] sm:$0xf]  ;;  %v351_v23 = vld [vmem:[%s532_s1 + $0x88] sm:$0xf0]  ;;  %v300_v24 = vor.u32 %v350_v19, %v299_v18 }
   0x7   :  { %v304_v25 = vor.u32 %v349_v20, %v301_v21  ;;  %v308_v26 = vor.u32 %v351_v23, %v307_v22  ;;  %v287_v27 = vld [vmem:[%s532_s1 + $0x60] sm:$0xf]  ;;  %v347_v28 = vld [vmem:[%s532_s1 + $0x68] sm:$0xf0]  ;;  %v346_v29 = vld [vmem:[%s532_s1 + $0x64] sm:$0xf] }
   0x8   :  { %180 = vmatpush.bf16.msra.mxu0 %v312_v12  ;;  %v289_v30 = vld [vmem:[%s532_s1 + $0x6c] sm:$0xf0]  ;;  %v295_v31 = vld [vmem:[%s532_s1 + $0x68] sm:$0xf]  ;;  %v348_v32 = vld [vmem:[%s532_s1 + $0x70] sm:$0xf0]  ;;  %v288_v33 = vor.u32 %v347_v28, %v287_v27 }
   0x9   :  { %194 = vmatpush.bf16.msra.mxu1 %v316_v16  ;;  %208 = vmatpush.bf16.msra.mxu2 %v320_v17  ;;  %v292_v34 = vor.u32 %v346_v29, %v289_v30  ;;  %v296_v35 = vor.u32 %v348_v32, %v295_v31  ;;  %v275_v36 = vld [vmem:[%s532_s1 + $0x48] sm:$0xf]  ;;  %v344_v37 = vld [vmem:[%s532_s1 + $0x50] sm:$0xf0]  ;;  %v343_v38 = vld [vmem:[%s532_s1 + $0x4c] sm:$0xf] }
   0xa   :  { %v277_v39 = vld [vmem:[%s532_s1 + $0x54] sm:$0xf0]  ;;  %v283_v40 = vld [vmem:[%s532_s1 + $0x50] sm:$0xf]  ;;  %v345_v41 = vld [vmem:[%s532_s1 + $0x58] sm:$0xf0]  ;;  %v276_v42 = vor.u32 %v344_v37, %v275_v36 }
   0xb   :  { %v280_v43 = vor.u32 %v343_v38, %v277_v39  ;;  %v284_v44 = vor.u32 %v345_v41, %v283_v40  ;;  %v263_v45 = vld [vmem:[%s532_s1 + $0x30] sm:$0xf]  ;;  %v341_v46 = vld [vmem:[%s532_s1 + $0x38] sm:$0xf0]  ;;  %v340_v47 = vld [vmem:[%s532_s1 + $0x34] sm:$0xf] }
   0xc   :  { %181 = vmatpush.bf16.msra.mxu0 %v300_v24  ;;  %v265_v48 = vld [vmem:[%s532_s1 + $0x3c] sm:$0xf0]  ;;  %v271_v49 = vld [vmem:[%s532_s1 + $0x38] sm:$0xf]  ;;  %v342_v50 = vld [vmem:[%s532_s1 + $0x40] sm:$0xf0]  ;;  %v264_v51 = vor.u32 %v341_v46, %v263_v45 }
   0xd   :  { %195 = vmatpush.bf16.msra.mxu1 %v304_v25  ;;  %209 = vmatpush.bf16.msra.mxu2 %v308_v26  ;;  %v268_v52 = vor.u32 %v340_v47, %v265_v48  ;;  %v272_v53 = vor.u32 %v342_v50, %v271_v49  ;;  %v251_v54 = vld [vmem:[%s532_s1 + $0x18] sm:$0xf]  ;;  %v338_v55 = vld [vmem:[%s532_s1 + $0x20] sm:$0xf0]  ;;  %v337_v56 = vld [vmem:[%s532_s1 + $0x1c] sm:$0xf] }
   0xe   :  { %v253_v57 = vld [vmem:[%s532_s1 + $0x24] sm:$0xf0]  ;;  %v259_v58 = vld [vmem:[%s532_s1 + $0x20] sm:$0xf]  ;;  %v339_v59 = vld [vmem:[%s532_s1 + $0x28] sm:$0xf0]  ;;  %v252_v60 = vor.u32 %v338_v55, %v251_v54 }
   0xf   :  { %v256_v61 = vor.u32 %v337_v56, %v253_v57  ;;  %v260_v62 = vor.u32 %v339_v59, %v259_v58  ;;  %v239_v63 = vld [vmem:[%s532_s1] sm:$0xf]  ;;  %v335_v0 = vld [vmem:[%s532_s1 + $0x8] sm:$0xf0]  ;;  %v334_v1 = vld [vmem:[%s532_s1 + $0x4] sm:$0xf] }
  0x10   :  { %182 = vmatpush.bf16.msra.mxu0 %v288_v33  ;;  %v241_v2 = vld [vmem:[%s532_s1 + $0xc] sm:$0xf0]  ;;  %v247_v3 = vld [vmem:[%s532_s1 + $0x8] sm:$0xf]  ;;  %v336_v4 = vld [vmem:[%s532_s1 + $0x10] sm:$0xf0]  ;;  %v240_v5 = vor.u32 %v335_v0, %v239_v63 }
  0x11   :  { %196 = vmatpush.bf16.msra.mxu1 %v292_v34  ;;  %210 = vmatpush.bf16.msra.mxu2 %v296_v35  ;;  %v244_v6 = vor.u32 %v334_v1, %v241_v2  ;;  %v248_v7 = vor.u32 %v336_v4, %v247_v3  ;;  %v333_v8 = vld [vmem:[%s533_s0] sm:$0xff] }
  0x14   :  { %183 = vmatpush.bf16.msra.mxu0 %v276_v42 }
  0x15   :  { %197 = vmatpush.bf16.msra.mxu1 %v280_v43  ;;  %211 = vmatpush.bf16.msra.mxu2 %v284_v44 }
  0x18   :  { %184 = vmatpush.bf16.msra.mxu0 %v264_v51 }
  0x19   :  { %198 = vmatpush.bf16.msra.mxu1 %v268_v52  ;;  %212 = vmatpush.bf16.msra.mxu2 %v272_v53 }
  0x1c   :  { %185 = vmatpush.bf16.msra.mxu0 %v252_v60 }
  0x1d   :  { %199 = vmatpush.bf16.msra.mxu1 %v256_v61  ;;  %213 = vmatpush.bf16.msra.mxu2 %v260_v62 }
  0x20   :  { %186 = vmatpush.bf16.msra.mxu0 %v240_v5 }
  0x21   :  { %200 = vmatpush.bf16.msra.mxu1 %v244_v6  ;;  %214 = vmatpush.bf16.msra.mxu2 %v248_v7 }
  0x23   :  { %187 = vmatmul.bf16.vlgmr.msra.gmra.mxu0 %v333_v8 }
  0x24   :  { %201 = vmatmul.bf16.vlgmr.msra.gmra.mxu1 %v333_v8  ;;  %215 = vmatmul.bf16.vlgmr.msra.gmra.mxu2 %v333_v8 }
  0xa0   :  { %v188_v9 = vpop.f32.mrf.mxu0 }
  0xa1   :  { %v202_v10 = vpop.f32.mrf.mxu1 }
  0xa2   :  { %v221_v11 = vpack.c.bf16 %v202_v10, %v188_v9 }
  0xa4   :  { %225 = vst [vmem:[%s534_s2] sm:$0xff] %v221_v11 }
  0xa7   :  { %v216_v12 = vpop.f32.mrf.mxu2 }
  0xa8   :  { %v222_v13 = vpack.c.bf16 %v216_v12, %v216_v12  ;;  %v190_v14 = vpop.f32.mrf.mxu0 }
  0xa9   :  { %v204_v15 = vpop.f32.mrf.mxu1 }
  0xaa   :  { %226 = vst [vmem:[%s534_s2 + $0x8] sm:$0xf] %v222_v13  ;;  %v223_v16 = vpack.c.bf16 %v204_v15, %v190_v14 }
  0xac   :  { %227 = vst [vmem:[%s534_s2 + $0xc] sm:$0xff] %v223_v16 }
  0xaf   :  { %v218_v17 = vpop.f32.mrf.mxu2 }
  0xb0   :  { %v224_v18 = vpack.c.bf16 %v218_v17, %v218_v17 }
  0xb2   :  { %228 = vst [vmem:[%s534_s2 + $0x14] sm:$0xf] %v224_v18 }

// kernel: upsample_generator_forward.7
= control target key start
LH: loop header
LB: loop body
LE: loop exit
PB: predicated region body
PF: predicated region fallthrough
CT: control target
= control target key end

     0   :  { %vm39_vm0 = vcmask 1045504   ;;  %vm35_vm1 = vcmask 97280   ;;  %vm165_vm2 = vcmask 261120   ;;  %s645_s0 = inlined_call_operand.vmem [shape: bf16[12,256], index: 0, kind: input, shape index: {}]   ;;  %s646_s2 = inlined_call_operand.vmem [shape: f32[256,32], index: 2, kind: input, shape index: {}]   ;;  %s647_s1 = inlined_call_operand.vmem [shape: bf16[8,12], index: 1, kind: input, shape index: {}]   ;;  %s648_s3 = inlined_call_operand.vmem [shape: f32[32,256], index: 3, kind: input, shape index: {}]   ;;  %s649_s4 = inlined_call_operand.vmem [shape: f32[1,256], index: 4, kind: input, shape index: {}]   ;;  %s650_s5 = inlined_call_operand.vmem [shape: f32[1,256], index: 5, kind: input, shape index: {}]   ;;  %s651_s6 = inlined_call_operand.vmem [shape: f32[8,256], index: 6, kind: output, shape index: {}]  }
   0x1   :  { %v365_v0 = vld [vmem:[%s645_s0] sm:$0xf]  ;;  %v378_v1 = vld [vmem:[%s645_s0 + $0x4] sm:$0x30]  ;;  %v377_v2 = vld [vmem:[%s645_s0 + $0x4] sm:$0xf] }
   0x2   :  { %v366_v3 = vor.u32 %v378_v1, %v365_v0  ;;  %v367_v4 = vld [vmem:[%s645_s0 + $0x8] sm:$0x30]  ;;  %v103_v5 = vld [vmem:[%s646_s2 + $0xf8] sm:$0xff]  ;;  %v102_v7 = vld [vmem:[%s646_s2 + $0xf0] sm:$0xff] }
   0x3   :  { %v370_v6 = vor.u32 %v377_v2, %v367_v4  ;;  %144 = vmatpush.msra.mxu3 %v103_v5  ;;  %v439_v8 = vld [vmem:[%s646_s2 + $0x78] sm:$0xff]  ;;  %v101_v10 = vld [vmem:[%s646_s2 + $0xe8] sm:$0xff]  ;;  %v24_v12 = vld [vmem:[%s647_s1] sm:$0xf] }
   0x4   :  { %v41_v9 = vsel %vm39_vm0, %v366_v3, 0  ;;  %v100_v13 = vld [vmem:[%s646_s2 + $0xe0] sm:$0xff]  ;;  %v456_v14 = vld [vmem:[%s646_s2 + $0x70] sm:$0xff]  ;;  %v99_v15 = vld [vmem:[%s646_s2 + $0xd8] sm:$0xff] }
   0x5   :  { %53 = vmatpush.bf16.msra.mxu2 %v41_v9  ;;  %v44_v11 = vsel %vm39_vm0, %v370_v6, 0  ;;  %145 = vmatpush.msra.mxu3 %v102_v7  ;;  %v464_v16 = vld [vmem:[%s646_s2 + $0x68] sm:$0xff]  ;;  %v98_v17 = vld [vmem:[%s646_s2 + $0xd0] sm:$0xff]  ;;  %v473_v18 = vld [vmem:[%s646_s2 + $0x60] sm:$0xff] }
   0x6   :  { %66 = vmatpush.bf16.msra.mxu1 %v44_v11  ;;  %v97_v19 = vld [vmem:[%s646_s2 + $0xc8] sm:$0xff]  ;;  %v482_v20 = vld [vmem:[%s646_s2 + $0x58] sm:$0xff]  ;;  %v96_v21 = vld [vmem:[%s646_s2 + $0xc0] sm:$0xff] }
   0x7   :  { %146 = vmatpush.msra.mxu3 %v101_v10  ;;  %v491_v22 = vld [vmem:[%s646_s2 + $0x50] sm:$0xff]  ;;  %v95_v23 = vld [vmem:[%s646_s2 + $0xb8] sm:$0xff]  ;;  %v501_v24 = vld [vmem:[%s646_s2 + $0x48] sm:$0xff] }
   0x8   :  { %371 = vmatmul.msk.bf16.vlgmr.msra.gmra.mxu2 %vm35_vm1, %v24_v12  ;;  %v94_v25 = vld [vmem:[%s646_s2 + $0xb0] sm:$0xff]  ;;  %v510_v26 = vld [vmem:[%s646_s2 + $0x40] sm:$0xff]  ;;  %v93_v27 = vld [vmem:[%s646_s2 + $0xa8] sm:$0xff] }
   0x9   :  { %124 = vmatpush.msrb.mxu2 %v439_v8  ;;  %372 = vmatmul.msk.bf16.vlgmr.msra.gmra.mxu1 %vm35_vm1, %v24_v12  ;;  %v519_v28 = vld [vmem:[%s646_s2 + $0x38] sm:$0xff]  ;;  %v92_v29 = vld [vmem:[%s646_s2 + $0xa0] sm:$0xff]  ;;  %v528_v30 = vld [vmem:[%s646_s2 + $0x30] sm:$0xff] }
   0xa   :  { %247 = vmatpush.msrb.mxu1 %v103_v5  ;;  %147 = vmatpush.msra.mxu3 %v100_v13  ;;  %v91_v31 = vld [vmem:[%s646_s2 + $0x98] sm:$0xff]  ;;  %v537_v32 = vld [vmem:[%s646_s2 + $0x28] sm:$0xff]  ;;  %v90_v33 = vld [vmem:[%s646_s2 + $0x90] sm:$0xff] }
   0xb   :  { %125 = vmatpush.msrb.mxu2 %v456_v14  ;;  %v546_v34 = vld [vmem:[%s646_s2 + $0x20] sm:$0xff]  ;;  %v89_v35 = vld [vmem:[%s646_s2 + $0x88] sm:$0xff]  ;;  %v555_v36 = vld [vmem:[%s646_s2 + $0x18] sm:$0xff] }
   0xc   :  { %248 = vmatpush.msrb.mxu1 %v102_v7  ;;  %148 = vmatpush.msra.mxu3 %v99_v15  ;;  %v88_v37 = vld [vmem:[%s646_s2 + $0x80] sm:$0xff]  ;;  %v564_v38 = vld [vmem:[%s646_s2 + $0x10] sm:$0xff]  ;;  %v569_v39 = vld [vmem:[%s646_s2 + $0x8] sm:$0xff] }
   0xd   :  { %126 = vmatpush.msrb.mxu2 %v464_v16  ;;  %v575_v40 = vld [vmem:[%s646_s2] sm:$0xff]  ;;  %v110_v57 = vld [vmem:[%s648_s3 + $0x30] sm:$0xff]  ;;  %v111_v61 = vld [vmem:[%s648_s3 + $0x38] sm:$0xff] }
   0xe   :  { %249 = vmatpush.msrb.mxu1 %v101_v10  ;;  %149 = vmatpush.msra.mxu3 %v98_v17  ;;  %v108_v58 = vld [vmem:[%s648_s3 + $0x20] sm:$0xff]  ;;  %v106_v59 = vld [vmem:[%s648_s3 + $0x10] sm:$0xff]  ;;  %v109_v62 = vld [vmem:[%s648_s3 + $0x28] sm:$0xff] }
   0xf   :  { %127 = vmatpush.msrb.mxu2 %v473_v18  ;;  %181 = vmatpush.msra.mxu0 %v110_v57  ;;  %v104_v60 = vld [vmem:[%s648_s3] sm:$0xff]  ;;  %v107_v63 = vld [vmem:[%s648_s3 + $0x18] sm:$0xff]  ;;  %v105_v0 = vld [vmem:[%s648_s3 + $0x8] sm:$0xff] }
  0x10   :  { %250 = vmatpush.msrb.mxu1 %v100_v13  ;;  %150 = vmatpush.msra.mxu3 %v97_v19 }
  0x11   :  { %128 = vmatpush.msrb.mxu2 %v482_v20  ;;  %182 = vmatpush.msra.mxu0 %v108_v58 }
  0x12   :  { %251 = vmatpush.msrb.mxu1 %v99_v15  ;;  %151 = vmatpush.msra.mxu3 %v96_v21 }
  0x13   :  { %129 = vmatpush.msrb.mxu2 %v491_v22  ;;  %183 = vmatpush.msra.mxu0 %v106_v59 }
  0x14   :  { %252 = vmatpush.msrb.mxu1 %v98_v17  ;;  %152 = vmatpush.msra.mxu3 %v95_v23 }
  0x15   :  { %130 = vmatpush.msrb.mxu2 %v501_v24  ;;  %184 = vmatpush.msra.mxu0 %v104_v60 }
  0x16   :  { %253 = vmatpush.msrb.mxu1 %v97_v19  ;;  %153 = vmatpush.msra.mxu3 %v94_v25 }
  0x17   :  { %131 = vmatpush.msrb.mxu2 %v510_v26  ;;  %201 = vmatpush.msrb.mxu0 %v111_v61 }
  0x18   :  { %254 = vmatpush.msrb.mxu1 %v96_v21  ;;  %154 = vmatpush.msra.mxu3 %v93_v27 }
  0x19   :  { %132 = vmatpush.msrb.mxu2 %v519_v28  ;;  %202 = vmatpush.msrb.mxu0 %v109_v62 }
  0x1a   :  { %255 = vmatpush.msrb.mxu1 %v95_v23  ;;  %155 = vmatpush.msra.mxu3 %v92_v29 }
  0x1b   :  { %133 = vmatpush.msrb.mxu2 %v528_v30  ;;  %203 = vmatpush.msrb.mxu0 %v107_v63 }
  0x1c   :  { %256 = vmatpush.msrb.mxu1 %v94_v25  ;;  %156 = vmatpush.msra.mxu3 %v91_v31 }
  0x1d   :  { %134 = vmatpush.msrb.mxu2 %v537_v32  ;;  %204 = vmatpush.msrb.mxu0 %v105_v0 }
  0x1e   :  { %257 = vmatpush.msrb.mxu1 %v93_v27  ;;  %157 = vmatpush.msra.mxu3 %v90_v33 }
  0x1f   :  { %135 = vmatpush.msrb.mxu2 %v546_v34 }
  0x20   :  { %258 = vmatpush.msrb.mxu1 %v92_v29  ;;  %158 = vmatpush.msra.mxu3 %v89_v35 }
  0x21   :  { %136 = vmatpush.msrb.mxu2 %v555_v36 }
  0x22   :  { %259 = vmatpush.msrb.mxu1 %v91_v31  ;;  %159 = vmatpush.msra.mxu3 %v88_v37 }
  0x23   :  { %137 = vmatpush.msrb.mxu2 %v564_v38 }
  0x24   :  { %260 = vmatpush.msrb.mxu1 %v90_v33  ;;  %303 = vmatpush.msrb.mxu3 %v111_v61 }
  0x25   :  { %138 = vmatpush.msrb.mxu2 %v569_v39 }
  0x26   :  { %261 = vmatpush.msrb.mxu1 %v89_v35  ;;  %304 = vmatpush.msrb.mxu3 %v109_v62 }
  0x27   :  { %139 = vmatpush.msrb.mxu2 %v575_v40 }
  0x28   :  { %262 = vmatpush.msrb.mxu1 %v88_v37  ;;  %305 = vmatpush.msrb.mxu3 %v107_v63 }
  0x29   :  { %283 = vmatpush.msra.mxu2 %v110_v57 }
  0x2a   :  { %306 = vmatpush.msrb.mxu3 %v105_v0 }
  0x2b   :  { %284 = vmatpush.msra.mxu2 %v108_v58 }
  0x2d   :  { %285 = vmatpush.msra.mxu2 %v106_v59 }
  0x2f   :  { %286 = vmatpush.msra.mxu2 %v104_v60 }
  0x86   :  { %v579_v41 = vpop.f32.mrf.mxu1 }
  0x87   :  { %v118_v42 = vrot.slane %v579_v41, 4 }
  0x89   :  { %v119_v43 = vadd.f32 %v118_v42, %v579_v41 }
  0x8b   :  { %v583_v44 = vpop.f32.mrf.mxu2  ;;  %v120_v45 = vrot.slane %v119_v43, 2 }
  0x8c   :  { %v112_v46 = vrot.slane %v583_v44, 4 }
  0x8d   :  { %v121_v47 = vadd.f32 %v120_v45, %v119_v43 }
  0x8e   :  { %v113_v48 = vadd.f32 %v112_v46, %v583_v44  ;;  %v70_v49 = vpop.f32.mrf.mxu1 }
  0x8f   :  { %v122_v50 = vrot.slane %v121_v47, 1 }
  0x90   :  { %v114_v51 = vrot.slane %v113_v48, 2 }
  0x91   :  { %v123_v52 = vadd.f32 %v122_v50, %v121_v47  ;;  %v343_v47 = vld [vmem:[%s650_s5] sm:$0x3] }
  0x92   :  { %v115_v53 = vadd.f32 %v114_v51, %v113_v48 }
  0x93   :  { %160 = vmatmul.f32.vlgmr.msra.gmra.mxu3 %v123_v52  ;;  %v57_v54 = vpop.f32.mrf.mxu2 }
  0x94   :  { %v116_v55 = vrot.slane %v115_v53, 1  ;;  %v345_v54 = vperm.slane %v343_v47, 0 }
  0x96   :  { %v117_v56 = vadd.f32 %v116_v55, %v115_v53 }
  0x98   :  { %140 = vmatmul.f32.vlgmr.msrb.gmra.mxu2 %v117_v56  ;;  %v346_v56 = vperm.slane %v343_v47, 1 }
 0x116   :  { %v161_v1 = vpop.f32.mrf.mxu3 }
 0x11b   :  { %v141_v2 = vpop.f32.mrf.mxu2 }
 0x11c   :  { %v162_v3 = vadd.f32 %v161_v1, %v141_v2 }
 0x11e   :  { %v164_v4 = vmul.f32 0.015625, %v162_v3 }
 0x120   :  { %373 = vmatmul.msk.f32.vlgmr.msra.gmra.mxu0 %vm165_vm2, %v164_v4 }
 0x121   :  { %227 = vmatpush.msra.mxu0 %v439_v8 }
 0x123   :  { %228 = vmatpush.msra.mxu0 %v456_v14 }
 0x125   :  { %229 = vmatpush.msra.mxu0 %v464_v16 }
 0x127   :  { %230 = vmatpush.msra.mxu0 %v473_v18 }
 0x128   :  { %374 = vmatmul.msk.f32.vlgmr.msrb.gmra.mxu0 %vm165_vm2, %v164_v4 }
 0x129   :  { %231 = vmatpush.msra.mxu0 %v482_v20 }
 0x12b   :  { %232 = vmatpush.msra.mxu0 %v491_v22 }
 0x12d   :  { %233 = vmatpush.msra.mxu0 %v501_v24 }
 0x12f   :  { %234 = vmatpush.msra.mxu0 %v510_v26 }
 0x131   :  { %235 = vmatpush.msra.mxu0 %v519_v28 }
 0x133   :  { %236 = vmatpush.msra.mxu0 %v528_v30 }
 0x135   :  { %237 = vmatpush.msra.mxu0 %v537_v32 }
 0x137   :  { %238 = vmatpush.msra.mxu0 %v546_v34 }
 0x139   :  { %239 = vmatpush.msra.mxu0 %v555_v36 }
 0x13b   :  { %240 = vmatpush.msra.mxu0 %v564_v38 }
 0x13d   :  { %241 = vmatpush.msra.mxu0 %v569_v39 }
 0x13f   :  { %242 = vmatpush.msra.mxu0 %v575_v40 }
 0x19d   :  { %v186_v5 = vpop.f32.mrf.mxu0 }
 0x19e   :  { %v209_v6 = vperm.slane %v186_v5, 0 }
 0x1a0   :  { %v211_v7 = vsub.f32 %v583_v44, %v209_v6  ;;  %v335_v44 = vld [vmem:[%s649_s4] sm:$0x3] }
 0x1a1   :  { %v337_v49 = vperm.slane %v335_v44, 0  ;;  %v338_v52 = vperm.slane %v335_v44, 1 }
 0x1a2   :  { %v213_v8 = vmul.f32 %v211_v7, %v211_v7 }
 0x1a4   :  { %v215_v9 = vrot.slane %v213_v8, 4 }
 0x1a5   :  { %v206_v10 = vpop.f32.mrf.mxu0 }
 0x1a6   :  { %v216_v11 = vadd.f32 %v215_v9, %v213_v8  ;;  %v210_v12 = vperm.slane %v206_v10, 0 }
 0x1a8   :  { %v217_v13 = vrot.slane %v216_v11, 2  ;;  %v212_v14 = vsub.f32 %v579_v41, %v210_v12 }
 0x1aa   :  { %v218_v15 = vadd.f32 %v217_v13, %v216_v11  ;;  %v214_v16 = vmul.f32 %v212_v14, %v212_v14 }
 0x1ac   :  { %v221_v17 = vrot.slane %v214_v16, 4  ;;  %v219_v18 = vrot.slane %v218_v15, 1 }
 0x1ae   :  { %v222_v19 = vadd.f32 %v221_v17, %v214_v16  ;;  %v220_v20 = vadd.f32 %v219_v18, %v218_v15 }
 0x1b0   :  { %243 = vmatmul.f32.vlgmr.msra.gmra.mxu0 %v220_v20  ;;  %v223_v21 = vrot.slane %v222_v19, 2 }
 0x1b2   :  { %v224_v22 = vadd.f32 %v223_v21, %v222_v19 }
 0x1b4   :  { %v225_v23 = vrot.slane %v224_v22, 1 }
 0x1b6   :  { %v226_v24 = vadd.f32 %v225_v23, %v224_v22 }
 0x1b8   :  { %263 = vmatmul.f32.vlgmr.msrb.gmra.mxu1 %v226_v24 }
 0x22d   :  { %v244_v25 = vpop.f32.mrf.mxu0 }
 0x235   :  { %v264_v26 = vpop.f32.mrf.mxu1 }
 0x236   :  { %v265_v27 = vadd.f32 %v264_v26, %v244_v25 }
 0x238   :  { %v267_v28 = vmul.f32 0.015625, %v265_v27 }
 0x23a   :  { %375 = vmatmul.msk.f32.vlgmr.msra.gmra.mxu2 %vm165_vm2, %v267_v28  ;;  %376 = vmatmul.msk.f32.vlgmr.msrb.gmra.mxu3 %vm165_vm2, %v267_v28 }
 0x2bd   :  { %v288_v29 = vpop.f32.mrf.mxu2  ;;  %v308_v30 = vpop.f32.mrf.mxu3 }
 0x2be   :  { %v289_v31 = vadd.f32 1e-05, %v288_v29  ;;  %v309_v32 = vadd.f32 1e-05, %v308_v30 }
 0x2c0   :  { %379 = vrsqrt.f32 %v289_v31  ;;  %vm317_vm5 = vweird.f32 %v289_v31  ;;  %vm327_vm7 = vweird.f32 %v309_v32 }
 0x2c1   :  { %381 = vrsqrt.f32 %v309_v32 }
 0x2c6   :  { %v380_v33 = vpop.eup %379 }
 0x2c7   :  { %v382_v34 = vpop.eup %381  ;;  %v312_v35 = vmul.f32 %v380_v33, %v289_v31  ;;  %vm318_vm3 = vweird.f32 %v380_v33 }
 0x2c8   :  { %v322_v36 = vmul.f32 %v382_v34, %v309_v32  ;;  %vm328_vm4 = vweird.f32 %v382_v34  ;;  %vm319_vm6 = vmor %vm317_vm5, %vm318_vm3 }
 0x2c9   :  { %v313_v37 = vmul.f32 %v380_v33, %v312_v35  ;;  %vm329_vm8 = vmor %vm327_vm7, %vm328_vm4 }
 0x2ca   :  { %v323_v38 = vmul.f32 %v382_v34, %v322_v36 }
 0x2cb   :  { %v314_v39 = vmul.f32 0.5, %v313_v37 }
 0x2cc   :  { %v324_v40 = vmul.f32 0.5, %v323_v38 }
 0x2cd   :  { %v315_v41 = vsub.f32 1.5, %v314_v39 }
 0x2ce   :  { %v325_v42 = vsub.f32 1.5, %v324_v40 }
 0x2cf   :  { %v316_v43 = vmul.f32 %v380_v33, %v315_v41 }
 0x2d0   :  { %v326_v45 = vmul.f32 %v382_v34, %v325_v42 }
 0x2d1   :  { %v320_v46 = vsel %vm319_vm6, %v380_v33, %v316_v43 }
 0x2d2   :  { %v331_v48 = vperm.slane %v320_v46, 0  ;;  %v330_v50 = vsel %vm329_vm8, %v382_v34, %v326_v45 }
 0x2d3   :  { %v332_v51 = vperm.slane %v330_v50, 0 }
 0x2d4   :  { %v333_v53 = vmul.f32 %v331_v48, %v211_v7 }
 0x2d5   :  { %v334_v55 = vmul.f32 %v332_v51, %v212_v14 }
 0x2d6   :  { %v341_v57 = vmul.f32 %v337_v49, %v333_v53 }
 0x2d7   :  { %v342_v58 = vmul.f32 %v338_v52, %v334_v55 }
 0x2d8   :  { %v349_v59 = vadd.f32 %v345_v54, %v341_v57 }
 0x2d9   :  { %v350_v60 = vadd.f32 %v346_v56, %v342_v58 }
 0x2da   :  { %vm351_vm9 = vcmp.ge.f32.partialorder %v349_v59, 0.0  ;;  %v353_v61 = vmul.f32 0.2, %v349_v59 }
 0x2db   :  { %vm352_vm10 = vcmp.ge.f32.partialorder %v350_v60, 0.0  ;;  %v354_v62 = vmul.f32 0.2, %v350_v60 }
 0x2dc   :  { %v355_v63 = vsel %vm351_vm9, %v349_v59, %v353_v61 }
 0x2dd   :  { %357 = vst [vmem:[%s651_s6] sm:$0xff] %v355_v63  ;;  %v356_v0 = vsel %vm352_vm10, %v350_v60, %v354_v62 }
 0x2de   :  { %358 = vst [vmem:[%s651_s6 + $0x8] sm:$0xff] %v356_v0 }

// kernel: upsample_generator_forward.9
= control target key start
LH: loop header
LB: loop body
LE: loop exit
PB: predicated region body
PF: predicated region fallthrough
CT: control target
= control target key end

     0   :  { %vm53_vm0 = vcmask 1043456   ;;  %vm49_vm1 = vcmask 195584   ;;  %vm179_vm2 = vcmask 130048   ;;  %s675_s0 = inlined_call_operand.vmem [shape: bf16[24,256], index: 0, kind: input, shape index: {}]   ;;  %s676_s2 = inlined_call_operand.vmem [shape: f32[256,16], index: 2, kind: input, shape index: {}]   ;;  %s677_s1 = inlined_call_operand.vmem [shape: bf16[16,24], index: 1, kind: input, shape index: {}]   ;;  %s678_s3 = inlined_call_operand.vmem [shape: f32[16,256], index: 3, kind: input, shape index: {}]   ;;  %s679_s4 = inlined_call_operand.vmem [shape: f32[1,256], index: 4, kind: input, shape index: {}]   ;;  %s680_s5 = inlined_call_operand.vmem [shape: f32[1,256], index: 5, kind: input, shape index: {}]   ;;  %s681_s6 = inlined_call_operand.vmem [shape: f32[16,256], index: 6, kind: output, shape index: {}]  }
   0x1   :  { %v28_v0 = vld [vmem:[%s675_s0 + $0x10] sm:$0xff]  ;;  %v403_v3 = vld [vmem:[%s675_s0] sm:$0xf]  ;;  %v119_v4 = vld [vmem:[%s676_s2 + $0xf8] sm:$0xff] }
   0x2   :  { %v41_v1 = vunpack.c.l.b16 %v28_v0  ;;  %v42_v2 = vunpack.c.h.b16 %v28_v0  ;;  %v118_v5 = vld [vmem:[%s676_s2 + $0xf0] sm:$0xff]  ;;  %v417_v8 = vld [vmem:[%s675_s0 + $0x4] sm:$0xf0]  ;;  %v416_v9 = vld [vmem:[%s675_s0 + $0x4] sm:$0xf]  ;;  %158 = vmatpush.msra.mxu3 %v119_v4 }
   0x3   :  { %v405_v10 = vld [vmem:[%s675_s0 + $0x8] sm:$0xf0]  ;;  %v404_v14 = vor.u32 %v417_v8, %v403_v3  ;;  %v116_v16 = vld [vmem:[%s676_s2 + $0xe0] sm:$0xff]  ;;  %v487_v17 = vld [vmem:[%s676_s2 + $0x78] sm:$0xff] }
   0x4   :  { %v45_v6 = vpack.c.b16 %v41_v1, %v41_v1  ;;  %v46_v7 = vpack.c.b16 %v42_v2, %v42_v2  ;;  %v117_v11 = vld [vmem:[%s676_s2 + $0xe8] sm:$0xff]  ;;  %159 = vmatpush.msra.mxu3 %v118_v5  ;;  %v408_v15 = vor.u32 %v416_v9, %v405_v10  ;;  %v415_v18 = vld [vmem:[%s677_s1] sm:$0xff]  ;;  %v496_v19 = vld [vmem:[%s676_s2 + $0x70] sm:$0xff] }
   0x5   :  { %v115_v20 = vld [vmem:[%s676_s2 + $0xd8] sm:$0xff]  ;;  %v505_v21 = vld [vmem:[%s676_s2 + $0x68] sm:$0xff]  ;;  %v114_v22 = vld [vmem:[%s676_s2 + $0xd0] sm:$0xff] }
   0x6   :  { %v55_v12 = vsel %vm53_vm0, %v45_v6, 0  ;;  %v58_v13 = vsel %vm53_vm0, %v46_v7, 0  ;;  %160 = vmatpush.msra.mxu3 %v117_v11  ;;  %v513_v23 = vld [vmem:[%s676_s2 + $0x60] sm:$0xff]  ;;  %v113_v24 = vld [vmem:[%s676_s2 + $0xc8] sm:$0xff]  ;;  %v523_v25 = vld [vmem:[%s676_s2 + $0x58] sm:$0xff] }
   0x7   :  { %66 = vmatpush.bf16.msra.mxu2 %v55_v12  ;;  %80 = vmatpush.bf16.msra.mxu1 %v58_v13  ;;  %v112_v26 = vld [vmem:[%s676_s2 + $0xc0] sm:$0xff]  ;;  %v532_v27 = vld [vmem:[%s676_s2 + $0x50] sm:$0xff]  ;;  %v111_v28 = vld [vmem:[%s676_s2 + $0xb8] sm:$0xff] }
   0x8   :  { %161 = vmatpush.msra.mxu3 %v116_v16  ;;  %v541_v29 = vld [vmem:[%s676_s2 + $0x48] sm:$0xff]  ;;  %v110_v30 = vld [vmem:[%s676_s2 + $0xb0] sm:$0xff]  ;;  %v550_v31 = vld [vmem:[%s676_s2 + $0x40] sm:$0xff] }
   0x9   :  { %v109_v32 = vld [vmem:[%s676_s2 + $0xa8] sm:$0xff]  ;;  %v559_v33 = vld [vmem:[%s676_s2 + $0x38] sm:$0xff]  ;;  %v108_v34 = vld [vmem:[%s676_s2 + $0xa0] sm:$0xff] }
   0xa   :  { %162 = vmatpush.msra.mxu3 %v115_v20  ;;  %v568_v35 = vld [vmem:[%s676_s2 + $0x30] sm:$0xff]  ;;  %v107_v36 = vld [vmem:[%s676_s2 + $0x98] sm:$0xff]  ;;  %v577_v37 = vld [vmem:[%s676_s2 + $0x28] sm:$0xff] }
   0xb   :  { %67 = vmatpush.bf16.msra.mxu2 %v404_v14  ;;  %81 = vmatpush.bf16.msra.mxu1 %v408_v15  ;;  %v106_v38 = vld [vmem:[%s676_s2 + $0x90] sm:$0xff]  ;;  %v586_v39 = vld [vmem:[%s676_s2 + $0x20] sm:$0xff]  ;;  %v105_v40 = vld [vmem:[%s676_s2 + $0x88] sm:$0xff] }
   0xc   :  { %163 = vmatpush.msra.mxu3 %v114_v22  ;;  %v595_v41 = vld [vmem:[%s676_s2 + $0x18] sm:$0xff]  ;;  %v104_v42 = vld [vmem:[%s676_s2 + $0x80] sm:$0xff]  ;;  %v90_v43 = vld [vmem:[%s676_s2 + $0x10] sm:$0xff] }
   0xd   :  { %v89_v44 = vld [vmem:[%s676_s2 + $0x8] sm:$0xff]  ;;  %v88_v45 = vld [vmem:[%s676_s2] sm:$0xff]  ;;  %v122_v0 = vld [vmem:[%s678_s3 + $0x10] sm:$0xff] }
   0xe   :  { %409 = vmatmul.msk.bf16.vlgmr.msra.gmra.mxu2 %vm49_vm1, %v415_v18  ;;  %410 = vmatmul.msk.bf16.vlgmr.msra.gmra.mxu1 %vm49_vm1, %v415_v18  ;;  %v120_v1 = vld [vmem:[%s678_s3] sm:$0xff]  ;;  %v123_v2 = vld [vmem:[%s678_s3 + $0x18] sm:$0xff]  ;;  %v121_v3 = vld [vmem:[%s678_s3 + $0x8] sm:$0xff] }
   0xf   :  { %138 = vmatpush.msrb.mxu2 %v487_v17  ;;  %267 = vmatpush.msrb.mxu1 %v119_v4 }
  0x10   :  { %164 = vmatpush.msra.mxu3 %v113_v24  ;;  %197 = vmatpush.msra.mxu0 %v122_v0 }
  0x11   :  { %268 = vmatpush.msrb.mxu1 %v118_v5  ;;  %139 = vmatpush.msrb.mxu2 %v496_v19 }
  0x12   :  { %165 = vmatpush.msra.mxu3 %v112_v26  ;;  %198 = vmatpush.msra.mxu0 %v120_v1 }
  0x13   :  { %269 = vmatpush.msrb.mxu1 %v117_v11  ;;  %140 = vmatpush.msrb.mxu2 %v505_v21 }
  0x14   :  { %166 = vmatpush.msra.mxu3 %v111_v28  ;;  %217 = vmatpush.msrb.mxu0 %v123_v2 }
  0x15   :  { %270 = vmatpush.msrb.mxu1 %v116_v16  ;;  %141 = vmatpush.msrb.mxu2 %v513_v23 }
  0x16   :  { %167 = vmatpush.msra.mxu3 %v110_v30  ;;  %218 = vmatpush.msrb.mxu0 %v121_v3 }
  0x17   :  { %271 = vmatpush.msrb.mxu1 %v115_v20  ;;  %142 = vmatpush.msrb.mxu2 %v523_v25 }
  0x18   :  { %168 = vmatpush.msra.mxu3 %v109_v32 }
  0x19   :  { %272 = vmatpush.msrb.mxu1 %v114_v22  ;;  %143 = vmatpush.msrb.mxu2 %v532_v27 }
  0x1a   :  { %169 = vmatpush.msra.mxu3 %v108_v34 }
  0x1b   :  { %273 = vmatpush.msrb.mxu1 %v113_v24  ;;  %144 = vmatpush.msrb.mxu2 %v541_v29 }
  0x1c   :  { %170 = vmatpush.msra.mxu3 %v107_v36 }
  0x1d   :  { %274 = vmatpush.msrb.mxu1 %v112_v26  ;;  %145 = vmatpush.msrb.mxu2 %v550_v31 }
  0x1e   :  { %171 = vmatpush.msra.mxu3 %v106_v38 }
  0x1f   :  { %275 = vmatpush.msrb.mxu1 %v111_v28  ;;  %146 = vmatpush.msrb.mxu2 %v559_v33 }
  0x20   :  { %172 = vmatpush.msra.mxu3 %v105_v40 }
  0x21   :  { %276 = vmatpush.msrb.mxu1 %v110_v30  ;;  %147 = vmatpush.msrb.mxu2 %v568_v35 }
  0x22   :  { %173 = vmatpush.msra.mxu3 %v104_v42 }
  0x23   :  { %277 = vmatpush.msrb.mxu1 %v109_v32  ;;  %148 = vmatpush.msrb.mxu2 %v577_v37 }
  0x24   :  { %325 = vmatpush.msrb.mxu3 %v123_v2 }
  0x25   :  { %278 = vmatpush.msrb.mxu1 %v108_v34  ;;  %149 = vmatpush.msrb.mxu2 %v586_v39 }
  0x26   :  { %326 = vmatpush.msrb.mxu3 %v121_v3 }
  0x27   :  { %279 = vmatpush.msrb.mxu1 %v107_v36  ;;  %150 = vmatpush.msrb.mxu2 %v595_v41 }
  0x29   :  { %280 = vmatpush.msrb.mxu1 %v106_v38  ;;  %151 = vmatpush.msrb.mxu2 %v90_v43 }
  0x2b   :  { %281 = vmatpush.msrb.mxu1 %v105_v40  ;;  %152 = vmatpush.msrb.mxu2 %v89_v44 }
  0x2d   :  { %282 = vmatpush.msrb.mxu1 %v104_v42  ;;  %153 = vmatpush.msrb.mxu2 %v88_v45 }
  0x2f   :  { %305 = vmatpush.msra.mxu2 %v122_v0 }
  0x31   :  { %306 = vmatpush.msra.mxu2 %v120_v1 }
  0x8b   :  { %v610_v46 = vpop.f32.mrf.mxu1 }
  0x91   :  { %v69_v47 = vpop.f32.mrf.mxu2 }
  0x93   :  { %v612_v48 = vpop.f32.mrf.mxu1 }
  0x94   :  { %v131_v49 = vadd.f32 %v612_v48, %v610_v46 }
  0x96   :  { %v132_v50 = vrot.slane %v131_v49, 4 }
  0x98   :  { %v133_v51 = vadd.f32 %v132_v50, %v131_v49 }
  0x99   :  { %v71_v52 = vpop.f32.mrf.mxu2 }
  0x9a   :  { %v124_v53 = vadd.f32 %v71_v52, %v69_v47  ;;  %v134_v54 = vrot.slane %v133_v51, 2 }
  0x9c   :  { %v125_v55 = vrot.slane %v124_v53, 4  ;;  %v135_v56 = vadd.f32 %v134_v54, %v133_v51 }
  0x9e   :  { %v126_v57 = vadd.f32 %v125_v55, %v124_v53  ;;  %v136_v58 = vrot.slane %v135_v56, 1  ;;  %v357_v53 = vld [vmem:[%s679_s4] sm:$0x3] }
  0xa0   :  { %v127_v59 = vrot.slane %v126_v57, 2  ;;  %v137_v60 = vadd.f32 %v136_v58, %v135_v56  ;;  %v367_v56 = vld [vmem:[%s680_s5] sm:$0x3]  ;;  %v359_v58 = vperm.slane %v357_v53, 0 }
  0xa1   :  { %v369_v0 = vperm.slane %v367_v56, 0  ;;  %v370_v3 = vperm.slane %v367_v56, 1 }
  0xa2   :  { %v128_v61 = vadd.f32 %v127_v59, %v126_v57  ;;  %174 = vmatmul.f32.vlgmr.msra.gmra.mxu3 %v137_v60 }
  0xa4   :  { %v129_v62 = vrot.slane %v128_v61, 1 }
  0xa6   :  { %v130_v63 = vadd.f32 %v129_v62, %v128_v61  ;;  %v360_v61 = vperm.slane %v357_v53, 1 }
  0xa8   :  { %154 = vmatmul.f32.vlgmr.msrb.gmra.mxu2 %v130_v63 }
 0x125   :  { %v175_v4 = vpop.f32.mrf.mxu3 }
 0x12b   :  { %v155_v5 = vpop.f32.mrf.mxu2 }
 0x12c   :  { %v176_v6 = vadd.f32 %v175_v4, %v155_v5 }
 0x12e   :  { %v178_v7 = vmul.f32 0.00390625, %v176_v6 }
 0x130   :  { %411 = vmatmul.msk.f32.vlgmr.msra.gmra.mxu0 %vm179_vm2, %v178_v7 }
 0x131   :  { %247 = vmatpush.msra.mxu0 %v487_v17 }
 0x133   :  { %248 = vmatpush.msra.mxu0 %v496_v19 }
 0x135   :  { %249 = vmatpush.msra.mxu0 %v505_v21 }
 0x137   :  { %250 = vmatpush.msra.mxu0 %v513_v23 }
 0x138   :  { %412 = vmatmul.msk.f32.vlgmr.msrb.gmra.mxu0 %vm179_vm2, %v178_v7 }
 0x139   :  { %251 = vmatpush.msra.mxu0 %v523_v25 }
 0x13b   :  { %252 = vmatpush.msra.mxu0 %v532_v27 }
 0x13d   :  { %253 = vmatpush.msra.mxu0 %v541_v29 }
 0x13f   :  { %254 = vmatpush.msra.mxu0 %v550_v31 }
 0x141   :  { %255 = vmatpush.msra.mxu0 %v559_v33 }
 0x143   :  { %256 = vmatpush.msra.mxu0 %v568_v35 }
 0x145   :  { %257 = vmatpush.msra.mxu0 %v577_v37 }
 0x147   :  { %258 = vmatpush.msra.mxu0 %v586_v39 }
 0x149   :  { %259 = vmatpush.msra.mxu0 %v595_v41 }
 0x14b   :  { %260 = vmatpush.msra.mxu0 %v90_v43 }
 0x14d   :  { %261 = vmatpush.msra.mxu0 %v89_v44 }
 0x14f   :  { %262 = vmatpush.msra.mxu0 %v88_v45 }
 0x1ad   :  { %v200_v8 = vpop.f32.mrf.mxu0 }
 0x1ae   :  { %v223_v9 = vperm.slane %v200_v8, 0 }
 0x1b0   :  { %v643_v10 = vsub.f32 %v69_v47, %v223_v9  ;;  %v645_v11 = vsub.f32 %v71_v52, %v223_v9 }
 0x1b2   :  { %v229_v12 = vmul.f32 %v643_v10, %v643_v10  ;;  %v231_v13 = vmul.f32 %v645_v11, %v645_v11 }
 0x1b4   :  { %v233_v14 = vadd.f32 %v231_v13, %v229_v12 }
 0x1b5   :  { %v220_v15 = vpop.f32.mrf.mxu0 }
 0x1b6   :  { %v234_v16 = vrot.slane %v233_v14, 4  ;;  %v224_v17 = vperm.slane %v220_v15, 0 }
 0x1b8   :  { %v235_v18 = vadd.f32 %v234_v16, %v233_v14  ;;  %v226_v19 = vsub.f32 %v610_v46, %v224_v17  ;;  %v228_v20 = vsub.f32 %v612_v48, %v224_v17 }
 0x1ba   :  { %v236_v21 = vrot.slane %v235_v18, 2  ;;  %v230_v22 = vmul.f32 %v226_v19, %v226_v19  ;;  %v232_v23 = vmul.f32 %v228_v20, %v228_v20 }
 0x1bc   :  { %v240_v24 = vadd.f32 %v232_v23, %v230_v22  ;;  %v237_v25 = vadd.f32 %v236_v21, %v235_v18 }
 0x1be   :  { %v241_v26 = vrot.slane %v240_v24, 4  ;;  %v238_v27 = vrot.slane %v237_v25, 1 }
 0x1c0   :  { %v239_v28 = vadd.f32 %v238_v27, %v237_v25  ;;  %v242_v29 = vadd.f32 %v241_v26, %v240_v24 }
 0x1c2   :  { %263 = vmatmul.f32.vlgmr.msra.gmra.mxu0 %v239_v28  ;;  %v243_v30 = vrot.slane %v242_v29, 2 }
 0x1c4   :  { %v244_v31 = vadd.f32 %v243_v30, %v242_v29 }
 0x1c6   :  { %v245_v32 = vrot.slane %v244_v31, 1 }
 0x1c8   :  { %v246_v33 = vadd.f32 %v245_v32, %v244_v31 }
 0x1ca   :  { %283 = vmatmul.f32.vlgmr.msrb.gmra.mxu1 %v246_v33 }
 0x23f   :  { %v264_v34 = vpop.f32.mrf.mxu0 }
 0x247   :  { %v284_v35 = vpop.f32.mrf.mxu1 }
 0x248   :  { %v285_v36 = vadd.f32 %v284_v35, %v264_v34 }
 0x24a   :  { %v287_v37 = vmul.f32 0.00390625, %v285_v36 }
 0x24c   :  { %413 = vmatmul.msk.f32.vlgmr.msra.gmra.mxu2 %vm179_vm2, %v287_v37  ;;  %414 = vmatmul.msk.f32.vlgmr.msrb.gmra.mxu3 %vm179_vm2, %v287_v37 }
 0x2cf   :  { %v308_v38 = vpop.f32.mrf.mxu2  ;;  %v328_v39 = vpop.f32.mrf.mxu3 }
 0x2d0   :  { %v309_v40 = vadd.f32 1e-05, %v308_v38  ;;  %v329_v41 = vadd.f32 1e-05, %v328_v39 }
 0x2d2   :  { %418 = vrsqrt.f32 %v309_v40  ;;  %vm337_vm5 = vweird.f32 %v309_v40  ;;  %vm347_vm7 = vweird.f32 %v329_v41 }
 0x2d3   :  { %420 = vrsqrt.f32 %v329_v41 }
 0x2d8   :  { %v419_v42 = vpop.eup %418 }
 0x2d9   :  { %v421_v43 = vpop.eup %420  ;;  %v332_v44 = vmul.f32 %v419_v42, %v309_v40  ;;  %vm338_vm3 = vweird.f32 %v419_v42 }
 0x2da   :  { %v342_v45 = vmul.f32 %v421_v43, %v329_v41  ;;  %vm348_vm4 = vweird.f32 %v421_v43  ;;  %vm339_vm6 = vmor %vm337_vm5, %vm338_vm3 }
 0x2db   :  { %v333_v46 = vmul.f32 %v419_v42, %v332_v44  ;;  %vm349_vm8 = vmor %vm347_vm7, %vm348_vm4 }
 0x2dc   :  { %v343_v47 = vmul.f32 %v421_v43, %v342_v45 }
 0x2dd   :  { %v334_v48 = vmul.f32 0.5, %v333_v46 }
 0x2de   :  { %v344_v49 = vmul.f32 0.5, %v343_v47 }
 0x2df   :  { %v335_v50 = vsub.f32 1.5, %v334_v48 }
 0x2e0   :  { %v345_v51 = vsub.f32 1.5, %v344_v49 }
 0x2e1   :  { %v336_v52 = vmul.f32 %v419_v42, %v335_v50 }
 0x2e2   :  { %v346_v54 = vmul.f32 %v421_v43, %v345_v51 }
 0x2e3   :  { %v340_v55 = vsel %vm339_vm6, %v419_v42, %v336_v52 }
 0x2e4   :  { %v351_v57 = vperm.slane %v340_v55, 0  ;;  %v350_v59 = vsel %vm349_vm8, %v421_v43, %v346_v54 }
 0x2e5   :  { %v352_v60 = vperm.slane %v350_v59, 0 }
 0x2e6   :  { %v353_v62 = vmul.f32 %v351_v57, %v643_v10  ;;  %v355_v63 = vmul.f32 %v351_v57, %v645_v11 }
 0x2e7   :  { %v354_v1 = vmul.f32 %v352_v60, %v226_v19  ;;  %v356_v2 = vmul.f32 %v352_v60, %v228_v20 }
 0x2e8   :  { %v363_v4 = vmul.f32 %v359_v58, %v353_v62  ;;  %v365_v5 = vmul.f32 %v359_v58, %v355_v63 }
 0x2e9   :  { %v364_v6 = vmul.f32 %v360_v61, %v354_v1  ;;  %v366_v7 = vmul.f32 %v360_v61, %v356_v2 }
 0x2ea   :  { %v373_v8 = vadd.f32 %v369_v0, %v363_v4  ;;  %v375_v9 = vadd.f32 %v369_v0, %v365_v5 }
 0x2eb   :  { %v374_v12 = vadd.f32 %v370_v3, %v364_v6  ;;  %v376_v13 = vadd.f32 %v370_v3, %v366_v7 }
 0x2ec   :  { %vm377_vm9 = vcmp.ge.f32.partialorder %v373_v8, 0.0  ;;  %vm379_vm10 = vcmp.ge.f32.partialorder %v375_v9, 0.0  ;;  %v381_v14 = vmul.f32 0.2, %v373_v8  ;;  %v383_v15 = vmul.f32 0.2, %v375_v9 }
 0x2ed   :  { %vm378_vm11 = vcmp.ge.f32.partialorder %v374_v12, 0.0  ;;  %vm380_vm12 = vcmp.ge.f32.partialorder %v376_v13, 0.0  ;;  %v382_v10 = vmul.f32 0.2, %v374_v12  ;;  %v384_v11 = vmul.f32 0.2, %v376_v13 }
 0x2ee   :  { %v385_v16 = vsel %vm377_vm9, %v373_v8, %v381_v14  ;;  %v387_v17 = vsel %vm379_vm10, %v375_v9, %v383_v15 }
 0x2ef   :  { %389 = vst [vmem:[%s681_s6] sm:$0xff] %v385_v16  ;;  %v386_v18 = vsel %vm378_vm11, %v374_v12, %v382_v10  ;;  %v388_v19 = vsel %vm380_vm12, %v376_v13, %v384_v11 }
 0x2f0   :  { %391 = vst [vmem:[%s681_s6 + $0x10] sm:$0xff] %v387_v17 }
 0x2f1   :  { %390 = vst [vmem:[%s681_s6 + $0x8] sm:$0xff] %v386_v18 }
 0x2f2   :  { %392 = vst [vmem:[%s681_s6 + $0x18] sm:$0xff] %v388_v19 }

// kernel: upsample_generator_forward.10
= control target key start
LH: loop header
LB: loop body
LE: loop exit
PB: predicated region body
PF: predicated region fallthrough
CT: control target
= control target key end

     0   :  { %vm253_vm0 = vcmask 257024   ;;  %s596_s1 = inlined_call_operand.vmem [shape: bf16[128,288], index: 1, kind: input, shape index: {}]   ;;  %s597_s0 = inlined_call_operand.vmem [shape: bf16[32,128], index: 0, kind: input, shape index: {}]   ;;  %s598_s2 = inlined_call_operand.vmem [shape: bf16[32,288], index: 2, kind: output, shape index: {}]  }
   0x1   :  { %v359_v0 = vld [vmem:[%s596_s1 + $0xa8] sm:$0xf]  ;;  %v393_v1 = vld [vmem:[%s596_s1 + $0xb0] sm:$0xf0]  ;;  %v392_v2 = vld [vmem:[%s596_s1 + $0xac] sm:$0xf] }
   0x2   :  { %v360_v3 = vor.u32 %v393_v1, %v359_v0  ;;  %v361_v4 = vld [vmem:[%s596_s1 + $0xb4] sm:$0xf0]  ;;  %v367_v5 = vld [vmem:[%s596_s1 + $0xb0] sm:$0xf]  ;;  %v394_v6 = vld [vmem:[%s596_s1 + $0xb8] sm:$0xf0] }
   0x3   :  { %v364_v7 = vor.u32 %v392_v2, %v361_v4  ;;  %v368_v8 = vor.u32 %v394_v6, %v367_v5  ;;  %v347_v9 = vld [vmem:[%s596_s1 + $0x90] sm:$0xf]  ;;  %v390_v10 = vld [vmem:[%s596_s1 + $0x98] sm:$0xf0]  ;;  %v389_v11 = vld [vmem:[%s596_s1 + $0x94] sm:$0xf] }
   0x4   :  { %187 = vmatpush.bf16.msra.mxu0 %v360_v3  ;;  %v348_v12 = vor.u32 %v390_v10, %v347_v9  ;;  %v349_v13 = vld [vmem:[%s596_s1 + $0x9c] sm:$0xf0]  ;;  %v355_v14 = vld [vmem:[%s596_s1 + $0x98] sm:$0xf]  ;;  %v391_v15 = vld [vmem:[%s596_s1 + $0xa0] sm:$0xf0]  ;;  %395 = vmatpush.bf16.msra.mxu3 %v360_v3 }
   0x5   :  { %206 = vmatpush.bf16.msra.mxu1 %v364_v7  ;;  %225 = vmatpush.bf16.msra.mxu2 %v368_v8  ;;  %v352_v16 = vor.u32 %v389_v11, %v349_v13  ;;  %v356_v17 = vor.u32 %v391_v15, %v355_v14  ;;  %v335_v18 = vld [vmem:[%s596_s1 + $0x78] sm:$0xf]  ;;  %v387_v19 = vld [vmem:[%s596_s1 + $0x80] sm:$0xf0]  ;;  %v386_v20 = vld [vmem:[%s596_s1 + $0x7c] sm:$0xf] }
   0x6   :  { %v337_v21 = vld [vmem:[%s596_s1 + $0x84] sm:$0xf0]  ;;  %v343_v22 = vld [vmem:[%s596_s1 + $0x80] sm:$0xf]  ;;  %v388_v23 = vld [vmem:[%s596_s1 + $0x88] sm:$0xf0]  ;;  %v336_v24 = vor.u32 %v387_v19, %v335_v18 }
   0x7   :  { %v340_v25 = vor.u32 %v386_v20, %v337_v21  ;;  %v344_v26 = vor.u32 %v388_v23, %v343_v22  ;;  %v323_v27 = vld [vmem:[%s596_s1 + $0x60] sm:$0xf]  ;;  %v384_v28 = vld [vmem:[%s596_s1 + $0x68] sm:$0xf0]  ;;  %v383_v29 = vld [vmem:[%s596_s1 + $0x64] sm:$0xf] }
   0x8   :  { %188 = vmatpush.bf16.msra.mxu0 %v348_v12  ;;  %396 = vmatpush.bf16.msra.mxu3 %v348_v12  ;;  %v325_v30 = vld [vmem:[%s596_s1 + $0x6c] sm:$0xf0]  ;;  %v331_v31 = vld [vmem:[%s596_s1 + $0x68] sm:$0xf]  ;;  %v385_v32 = vld [vmem:[%s596_s1 + $0x70] sm:$0xf0]  ;;  %v324_v33 = vor.u32 %v384_v28, %v323_v27 }
   0x9   :  { %207 = vmatpush.bf16.msra.mxu1 %v352_v16  ;;  %226 = vmatpush.bf16.msra.mxu2 %v356_v17  ;;  %v328_v34 = vor.u32 %v383_v29, %v325_v30  ;;  %v332_v35 = vor.u32 %v385_v32, %v331_v31  ;;  %v311_v36 = vld [vmem:[%s596_s1 + $0x48] sm:$0xf]  ;;  %v381_v37 = vld [vmem:[%s596_s1 + $0x50] sm:$0xf0]  ;;  %v380_v38 = vld [vmem:[%s596_s1 + $0x4c] sm:$0xf] }
   0xa   :  { %v313_v39 = vld [vmem:[%s596_s1 + $0x54] sm:$0xf0]  ;;  %v319_v40 = vld [vmem:[%s596_s1 + $0x50] sm:$0xf]  ;;  %v382_v41 = vld [vmem:[%s596_s1 + $0x58] sm:$0xf0]  ;;  %v312_v42 = vor.u32 %v381_v37, %v311_v36 }
   0xb   :  { %v316_v43 = vor.u32 %v380_v38, %v313_v39  ;;  %v320_v44 = vor.u32 %v382_v41, %v319_v40  ;;  %v299_v45 = vld [vmem:[%s596_s1 + $0x30] sm:$0xf]  ;;  %v378_v46 = vld [vmem:[%s596_s1 + $0x38] sm:$0xf0]  ;;  %v377_v47 = vld [vmem:[%s596_s1 + $0x34] sm:$0xf] }
   0xc   :  { %189 = vmatpush.bf16.msra.mxu0 %v336_v24  ;;  %397 = vmatpush.bf16.msra.mxu3 %v336_v24  ;;  %v301_v48 = vld [vmem:[%s596_s1 + $0x3c] sm:$0xf0]  ;;  %v307_v49 = vld [vmem:[%s596_s1 + $0x38] sm:$0xf]  ;;  %v379_v50 = vld [vmem:[%s596_s1 + $0x40] sm:$0xf0]  ;;  %v300_v51 = vor.u32 %v378_v46, %v299_v45 }
   0xd   :  { %208 = vmatpush.bf16.msra.mxu1 %v340_v25  ;;  %227 = vmatpush.bf16.msra.mxu2 %v344_v26  ;;  %v304_v52 = vor.u32 %v377_v47, %v301_v48  ;;  %v308_v53 = vor.u32 %v379_v50, %v307_v49  ;;  %v287_v54 = vld [vmem:[%s596_s1 + $0x18] sm:$0xf]  ;;  %v375_v55 = vld [vmem:[%s596_s1 + $0x20] sm:$0xf0]  ;;  %v374_v56 = vld [vmem:[%s596_s1 + $0x1c] sm:$0xf] }
   0xe   :  { %v289_v57 = vld [vmem:[%s596_s1 + $0x24] sm:$0xf0]  ;;  %v295_v58 = vld [vmem:[%s596_s1 + $0x20] sm:$0xf]  ;;  %v376_v59 = vld [vmem:[%s596_s1 + $0x28] sm:$0xf0]  ;;  %v288_v60 = vor.u32 %v375_v55, %v287_v54 }
   0xf   :  { %v292_v61 = vor.u32 %v374_v56, %v289_v57  ;;  %v296_v62 = vor.u32 %v376_v59, %v295_v58  ;;  %v275_v63 = vld [vmem:[%s596_s1] sm:$0xf]  ;;  %v372_v0 = vld [vmem:[%s596_s1 + $0x8] sm:$0xf0]  ;;  %v371_v1 = vld [vmem:[%s596_s1 + $0x4] sm:$0xf] }
  0x10   :  { %190 = vmatpush.bf16.msra.mxu0 %v324_v33  ;;  %398 = vmatpush.bf16.msra.mxu3 %v324_v33  ;;  %v277_v2 = vld [vmem:[%s596_s1 + $0xc] sm:$0xf0]  ;;  %v283_v3 = vld [vmem:[%s596_s1 + $0x8] sm:$0xf]  ;;  %v373_v4 = vld [vmem:[%s596_s1 + $0x10] sm:$0xf0]  ;;  %v276_v5 = vor.u32 %v372_v0, %v275_v63 }
  0x11   :  { %209 = vmatpush.bf16.msra.mxu1 %v328_v34  ;;  %228 = vmatpush.bf16.msra.mxu2 %v332_v35  ;;  %v280_v6 = vor.u32 %v371_v1, %v277_v2  ;;  %v284_v7 = vor.u32 %v373_v4, %v283_v3  ;;  %v369_v8 = vld [vmem:[%s597_s0] sm:$0xff]  ;;  %v370_v9 = vld [vmem:[%s597_s0 + $0x8] sm:$0xff] }
  0x14   :  { %191 = vmatpush.bf16.msra.mxu0 %v312_v42  ;;  %399 = vmatpush.bf16.msra.mxu3 %v312_v42 }
  0x15   :  { %210 = vmatpush.bf16.msra.mxu1 %v316_v43  ;;  %229 = vmatpush.bf16.msra.mxu2 %v320_v44 }
  0x18   :  { %192 = vmatpush.bf16.msra.mxu0 %v300_v51  ;;  %400 = vmatpush.bf16.msra.mxu3 %v300_v51 }
  0x19   :  { %211 = vmatpush.bf16.msra.mxu1 %v304_v52  ;;  %230 = vmatpush.bf16.msra.mxu2 %v308_v53 }
  0x1c   :  { %193 = vmatpush.bf16.msra.mxu0 %v288_v60  ;;  %401 = vmatpush.bf16.msra.mxu3 %v288_v60 }
  0x1d   :  { %212 = vmatpush.bf16.msra.mxu1 %v292_v61  ;;  %231 = vmatpush.bf16.msra.mxu2 %v296_v62 }
  0x20   :  { %194 = vmatpush.bf16.msra.mxu0 %v276_v5  ;;  %402 = vmatpush.bf16.msra.mxu3 %v276_v5 }
  0x21   :  { %213 = vmatpush.bf16.msra.mxu1 %v280_v6  ;;  %232 = vmatpush.bf16.msra.mxu2 %v284_v7 }
  0x23   :  { %195 = vmatmul.bf16.vlgmr.msra.gmra.mxu0 %v369_v8  ;;  %200 = vmatmul.bf16.vlgmr.msra.gmra.mxu3 %v370_v9 }
  0x24   :  { %214 = vmatmul.bf16.vlgmr.msra.gmra.mxu1 %v369_v8  ;;  %233 = vmatmul.bf16.vlgmr.msra.gmra.mxu2 %v369_v8 }
  0x34   :  { %219 = vmatmul.bf16.gmra.mxu1 %v370_v9  ;;  %238 = vmatmul.bf16.gmra.mxu2 %v370_v9 }
  0xa0   :  { %v196_v10 = vpop.f32.mrf.mxu0 }
  0xa1   :  { %v215_v11 = vpop.f32.mrf.mxu1 }
  0xa2   :  { %v244_v12 = vpack.c.bf16 %v215_v11, %v196_v10 }
  0xa4   :  { %252 = vst [vmem:[%s598_s2] sm:$0xff] %v244_v12 }
  0xa6   :  { %v201_v18 = vpop.f32.mrf.mxu3 }
  0xa7   :  { %v234_v13 = vpop.f32.mrf.mxu2 }
  0xa8   :  { %v245_v14 = vpack.c.bf16 %v234_v13, %v234_v13  ;;  %v198_v15 = vpop.f32.mrf.mxu0 }
  0xa9   :  { %v217_v16 = vpop.f32.mrf.mxu1 }
  0xaa   :  { %254 = vst.msk [vmem:[%s598_s2 + $0x8] sm:$0xf] %vm253_vm0, %v245_v14  ;;  %v246_v17 = vpack.c.bf16 %v217_v16, %v198_v15 }
  0xac   :  { %255 = vst [vmem:[%s598_s2 + $0xc] sm:$0xff] %v246_v17 }
  0xae   :  { %v203_v25 = vpop.f32.mrf.mxu3 }
  0xaf   :  { %v236_v19 = vpop.f32.mrf.mxu2 }
  0xb0   :  { %v247_v20 = vpack.c.bf16 %v236_v19, %v236_v19 }
  0xb1   :  { %v220_v21 = vpop.f32.mrf.mxu1 }
  0xb2   :  { %256 = vst.msk [vmem:[%s598_s2 + $0x14] sm:$0xf] %vm253_vm0, %v247_v20  ;;  %v248_v22 = vpack.c.bf16 %v220_v21, %v201_v18 }
  0xb4   :  { %257 = vst [vmem:[%s598_s2 + $0x18] sm:$0xff] %v248_v22 }
  0xb7   :  { %v239_v23 = vpop.f32.mrf.mxu2 }
  0xb8   :  { %v249_v24 = vpack.c.bf16 %v239_v23, %v239_v23 }
  0xb9   :  { %v222_v26 = vpop.f32.mrf.mxu1 }
  0xba   :  { %258 = vst.msk [vmem:[%s598_s2 + $0x20] sm:$0xf] %vm253_vm0, %v249_v24  ;;  %v250_v27 = vpack.c.bf16 %v222_v26, %v203_v25 }
  0xbc   :  { %259 = vst [vmem:[%s598_s2 + $0x24] sm:$0xff] %v250_v27 }
  0xbf   :  { %v241_v28 = vpop.f32.mrf.mxu2 }
  0xc0   :  { %v251_v29 = vpack.c.bf16 %v241_v28, %v241_v28 }
  0xc2   :  { %260 = vst.msk [vmem:[%s598_s2 + $0x2c] sm:$0xf] %vm253_vm0, %v251_v29 }

// kernel: upsample_generator_forward.11
= control target key start
LH: loop header
LB: loop body
LE: loop exit
PB: predicated region body
PF: predicated region fallthrough
CT: control target
= control target key end

     0   :  { %vm62_vm0 = vcmask 392192   ;;  %vm116_vm1 = vcmask 523264   ;;  %s279_s0 = inlined_call_operand.vmem [shape: bf16[48,192], index: 0, kind: input, shape index: {}]   ;;  %s280_s1 = inlined_call_operand.vmem [shape: bf16[32,48], index: 1, kind: input, shape index: {}]   ;;  %s281_s2 = inlined_call_operand.vmem [shape: f32[32,192], index: 2, kind: output, shape index: {}]  }
   0x1   :  { %v154_v0 = vld [vmem:[%s279_s0 + $0x20] sm:$0xf]  ;;  %v171_v1 = vld [vmem:[%s279_s0 + $0x24] sm:$0xf0]  ;;  %v170_v2 = vld [vmem:[%s279_s0 + $0x24] sm:$0xf] }
   0x2   :  { %v155_v3 = vor.u32 %v171_v1, %v154_v0  ;;  %v156_v4 = vld [vmem:[%s279_s0 + $0x28] sm:$0xf0]  ;;  %v146_v5 = vld [vmem:[%s279_s0 + $0x10] sm:$0xf]  ;;  %v169_v6 = vld [vmem:[%s279_s0 + $0x14] sm:$0xf0] }
   0x3   :  { %v159_v7 = vor.u32 %v170_v2, %v156_v4  ;;  %v168_v8 = vld [vmem:[%s279_s0 + $0x14] sm:$0xf]  ;;  %v148_v9 = vld [vmem:[%s279_s0 + $0x18] sm:$0xf0]  ;;  %v147_v10 = vor.u32 %v169_v6, %v146_v5  ;;  %v138_v12 = vld [vmem:[%s279_s0] sm:$0xf] }
   0x4   :  { %74 = vmatpush.bf16.msra.mxu0 %v155_v3  ;;  %172 = vmatpush.bf16.msra.mxu2 %v155_v3  ;;  %v151_v11 = vor.u32 %v168_v8, %v148_v9  ;;  %v167_v13 = vld [vmem:[%s279_s0 + $0x4] sm:$0xf0]  ;;  %v166_v14 = vld [vmem:[%s279_s0 + $0x4] sm:$0xf]  ;;  %v140_v15 = vld [vmem:[%s279_s0 + $0x8] sm:$0xf0] }
   0x5   :  { %93 = vmatpush.bf16.msra.mxu1 %v159_v7  ;;  %175 = vmatpush.bf16.msra.mxu3 %v159_v7  ;;  %v139_v16 = vor.u32 %v167_v13, %v138_v12  ;;  %v143_v17 = vor.u32 %v166_v14, %v140_v15  ;;  %v164_v18 = vld [vmem:[%s280_s1] sm:$0xff]  ;;  %v165_v19 = vld [vmem:[%s280_s1 + $0x8] sm:$0xff] }
   0x8   :  { %75 = vmatpush.bf16.msra.mxu0 %v147_v10  ;;  %173 = vmatpush.bf16.msra.mxu2 %v147_v10 }
   0x9   :  { %94 = vmatpush.bf16.msra.mxu1 %v151_v11  ;;  %176 = vmatpush.bf16.msra.mxu3 %v151_v11 }
   0xc   :  { %76 = vmatpush.bf16.msra.mxu0 %v139_v16  ;;  %174 = vmatpush.bf16.msra.mxu2 %v139_v16 }
   0xd   :  { %95 = vmatpush.bf16.msra.mxu1 %v143_v17  ;;  %177 = vmatpush.bf16.msra.mxu3 %v143_v17 }
   0xf   :  { %160 = vmatmul.msk.bf16.vlgmr.msra.gmra.mxu0 %vm62_vm0, %v164_v18  ;;  %161 = vmatmul.msk.bf16.vlgmr.msra.gmra.mxu2 %vm62_vm0, %v165_v19 }
  0x10   :  { %162 = vmatmul.msk.bf16.vlgmr.msra.gmra.mxu1 %vm62_vm0, %v164_v18  ;;  %163 = vmatmul.msk.bf16.vlgmr.msra.gmra.mxu3 %vm62_vm0, %v165_v19 }
  0x8c   :  { %v78_v20 = vpop.f32.mrf.mxu0 }
  0x8d   :  { %178 = vtanh.f32 %v78_v20  ;;  %v97_v21 = vpop.f32.mrf.mxu1 }
  0x8e   :  { %180 = vtanh.f32 %v97_v21 }
  0x92   :  { %v83_v22 = vpop.f32.mrf.mxu2 }
  0x93   :  { %v179_v23 = vpop.eup %178  ;;  %182 = vtanh.f32 %v83_v22  ;;  %v102_v24 = vpop.f32.mrf.mxu3 }
  0x94   :  { %v181_v25 = vpop.eup %180  ;;  %115 = vst [vmem:[%s281_s2] sm:$0xff] %v179_v23  ;;  %184 = vtanh.f32 %v102_v24  ;;  %v80_v26 = vpop.f32.mrf.mxu0 }
  0x95   :  { %117 = vst.msk [vmem:[%s281_s2 + $0x8] sm:$0xff] %vm116_vm1, %v181_v25  ;;  %186 = vtanh.f32 %v80_v26  ;;  %v99_v27 = vpop.f32.mrf.mxu1 }
  0x96   :  { %188 = vtanh.f32 %v99_v27 }
  0x99   :  { %v183_v28 = vpop.eup %182 }
  0x9a   :  { %v185_v29 = vpop.eup %184  ;;  %120 = vst [vmem:[%s281_s2 + $0x20] sm:$0xff] %v183_v28  ;;  %v85_v30 = vpop.f32.mrf.mxu2 }
  0x9b   :  { %v187_v31 = vpop.eup %186  ;;  %121 = vst.msk [vmem:[%s281_s2 + $0x28] sm:$0xff] %vm116_vm1, %v185_v29  ;;  %190 = vtanh.f32 %v85_v30  ;;  %v104_v32 = vpop.f32.mrf.mxu3 }
  0x9c   :  { %v189_v33 = vpop.eup %188  ;;  %118 = vst [vmem:[%s281_s2 + $0x10] sm:$0xff] %v187_v31  ;;  %192 = vtanh.f32 %v104_v32 }
  0x9d   :  { %119 = vst.msk [vmem:[%s281_s2 + $0x18] sm:$0xff] %vm116_vm1, %v189_v33 }
  0xa1   :  { %v191_v34 = vpop.eup %190 }
  0xa2   :  { %v193_v35 = vpop.eup %192  ;;  %122 = vst [vmem:[%s281_s2 + $0x30] sm:$0xff] %v191_v34 }
  0xa3   :  { %123 = vst.msk [vmem:[%s281_s2 + $0x38] sm:$0xff] %vm116_vm1, %v193_v35 }

</bundles_post_ra>
